<compile_context>
chip_gen: v7x
topology: tpu7x:2x2x1
jax: 0.10.0
libtpu: 0.0.40
codegen_flags: <defaults>
</compile_context>

<pallas_src>
import math

import jax
import jax.numpy as jnp
from jax.experimental import pallas as pl
from jax.experimental.pallas import tpu as pltpu

EMBED = 32
HEADS = 4
HEAD_DIM = EMBED // HEADS
FWD_EXP = 4
HIDDEN = FWD_EXP * EMBED
LN_EPS = 1e-5
NEG_INF = -1e20


# ----------------------------------------------------------------------------
# In-kernel helpers
# ----------------------------------------------------------------------------
def _layer_norm(y, g, b):
    mu = jnp.mean(y, axis=-1, keepdims=True)
    var = jnp.mean(jnp.square(y - mu), axis=-1, keepdims=True)
    return (y - mu) * jax.lax.rsqrt(var + jnp.float32(LN_EPS)) * g + b


def _attend(q, k, v, mask_ref, bblk, lq, lk, wo_t, bo):
    """Multi-head attention core.

    q        : (bblk*lq, E) queries (scale 1/sqrt(E) already folded in)
    k, v     : (bblk*lk, E) keys / values
    mask_ref : ref with block (bblk, lq, lk) additive mask (0 or -1e20)
    wo_t     : (E, E) fc_out weight, pre-transposed
    bo       : (1, E) fc_out bias
    """
    ctx_rows = []
    for b in range(bblk):
        qb = q[b * lq:(b + 1) * lq, :]
        kb = k[b * lk:(b + 1) * lk, :]
        vb = v[b * lk:(b + 1) * lk, :]
        mb = mask_ref[b]                                   # (lq, lk)
        heads = []
        for h in range(HEADS):
            sl = slice(h * HEAD_DIM, (h + 1) * HEAD_DIM)
            # energy = qh @ kh^T without an explicit transpose (NT dot_general)
            e = jax.lax.dot_general(
                qb[:, sl], kb[:, sl], (((1,), (1,)), ((), ())),
                preferred_element_type=jnp.float32)        # (lq, lk)
            e = e + mb
            e = e - jnp.max(e, axis=-1, keepdims=True)
            p = jnp.exp(e)
            # softmax denom via EUP approximate reciprocal (free issue slot)
            attn = p * pl.reciprocal(jnp.sum(p, axis=-1, keepdims=True),
                                     approx=True)
            heads.append(jnp.dot(attn, vb[:, sl],
                                 preferred_element_type=jnp.float32))   # (lq, D)
        ctx_rows.append(jnp.concatenate(heads, axis=-1))   # (lq, E)
    ctx = ctx_rows[0] if bblk == 1 else jnp.concatenate(ctx_rows, axis=0)
    # single fused output projection over all heads
    return jnp.dot(ctx, wo_t, preferred_element_type=jnp.float32) + bo


# ----------------------------------------------------------------------------
# Single fused kernel: the entire DecoderBlock forward for one batch block
# ----------------------------------------------------------------------------
def _decoder_block_kernel(
        x_ref, val_ref, key_ref, trg_ref, src_ref,
        wqkv1_ref, wo1_ref, bo1_ref, ng_ref, nbias_ref,
        wq2_ref, wk2_ref, wv2_ref, wo2_ref, bo2_ref, n1g_ref, n1b_ref,
        w1_ref, b1_ref, w2_ref, b2_ref, n2g_ref, n2b_ref,
        o_ref):
    bblk, lq, e = x_ref.shape
    lk = key_ref.shape[1]

    x = x_ref[...].reshape(bblk * lq, e)
    value = val_ref[...].reshape(bblk * lk, e)
    key = key_ref[...].reshape(bblk * lk, e)

    # 1) masked self-attention on x: one fused QKV matmul, residual, LayerNorm
    qkv = jnp.dot(x, wqkv1_ref[...], preferred_element_type=jnp.float32)  # (bblk*lq, 3E)
    a1 = _attend(qkv[:, 0:e], qkv[:, e:2 * e], qkv[:, 2 * e:3 * e],
                 trg_ref, bblk, lq, lq, wo1_ref[...], bo1_ref[...])
    query = _layer_norm(a1 + x, ng_ref[...], nbias_ref[...])

    # 2) TransformerBlock cross-attention: Q = query, K = key, V = value
    q2 = jnp.dot(query, wq2_ref[...], preferred_element_type=jnp.float32)
    k2 = jnp.dot(key, wk2_ref[...], preferred_element_type=jnp.float32)
    v2 = jnp.dot(value, wv2_ref[...], preferred_element_type=jnp.float32)
    a2 = _attend(q2, k2, v2, src_ref, bblk, lq, lk, wo2_ref[...], bo2_ref[...])
    x2 = _layer_norm(a2 + query, n1g_ref[...], n1b_ref[...])

    # 3) feed-forward + residual + LayerNorm  (dropout = identity)
    h = jnp.maximum(
        jnp.dot(x2, w1_ref[...], preferred_element_type=jnp.float32) + b1_ref[...],
        jnp.float32(0.0))
    y = jnp.dot(h, w2_ref[...], preferred_element_type=jnp.float32) + b2_ref[...] + x2
    o_ref[...] = _layer_norm(y, n2g_ref[...], n2b_ref[...]).reshape(bblk, lq, e)


# ----------------------------------------------------------------------------
# Host-side weight packing (done ONCE, outside the per-call path)
# ----------------------------------------------------------------------------
def _block_diag(w, scale=1.0):
    """(D,D) shared per-head weight -> (E,E) block-diagonal of (w.T * scale)."""
    wt = (w.T * jnp.float32(scale)).astype(jnp.float32)
    out = jnp.zeros((EMBED, EMBED), jnp.float32)
    for h in range(HEADS):
        sl = slice(h * HEAD_DIM, (h + 1) * HEAD_DIM)
        out = out.at[sl, sl].set(wt)
    return out


def pack_params(p):
    scale = 1.0 / math.sqrt(EMBED)
    return {
        "wqkv1": jnp.concatenate([_block_diag(p["wq1"], scale),
                                  _block_diag(p["wk1"]),
                                  _block_diag(p["wv1"])], axis=1),      # (E, 3E)
        "wo1": p["wo1"].T.astype(jnp.float32), "bo1": p["bo1"],
        "ng": p["ng"], "nb": p["nb"],
        "wq2": _block_diag(p["wq2"], scale),
        "wk2": _block_diag(p["wk2"]),
        "wv2": _block_diag(p["wv2"]),
        "wo2": p["wo2"].T.astype(jnp.float32), "bo2": p["bo2"],
        "n1g": p["n1g"], "n1b": p["n1b"],
        "w1": p["w1"].T.astype(jnp.float32), "b1": p["b1"],             # (E, HIDDEN)
        "w2": p["w2"].T.astype(jnp.float32), "b2": p["b2"],             # (HIDDEN, E)
        "n2g": p["n2g"], "n2b": p["n2b"],
    }


# ----------------------------------------------------------------------------
# Wrapper: one pallas_call, batch-blocked grid
# ----------------------------------------------------------------------------
@jax.jit
def decoder_block(x, value, key, src_mask, trg_mask, packed):
    N, L, E = x.shape
    Lk = key.shape[1]

    # Batch blocking: even batch -> 2 grid steps ("parallel" -> one per TC on a
    # v7x megacore); otherwise a single step holding the whole batch (a batch
    # grid is a pure serial loop on 1-TC v5e/v6e, so fewer/fatter steps win).
    bblk = N // 2 if (N >= 2 and N % 2 == 0) else N
    grid = (N // bblk,)

    # Additive masks (0 / -1e20), computed once per call inside the jit.
    trg_add = jnp.where(trg_mask == 0, jnp.float32(NEG_INF), jnp.float32(0.0))
    trg_add = jnp.broadcast_to(trg_add, (N, 1, L, L)).reshape(N, L, L)
    src_add = jnp.where(src_mask == 0, jnp.float32(NEG_INF), jnp.float32(0.0))
    src_add = jnp.broadcast_to(src_add, (N, 1, L, Lk)).reshape(N, L, Lk)

    def batched(arr):
        nd = arr.ndim
        return pl.BlockSpec((bblk,) + tuple(arr.shape[1:]),
                            lambda i, _nd=nd: (i,) + (0,) * (_nd - 1))

    def shared(arr):
        nd = arr.ndim
        return pl.BlockSpec(tuple(arr.shape), lambda i, _nd=nd: (0,) * _nd)

    weight_order = ["wqkv1", "wo1", "bo1", "ng", "nb",
                    "wq2", "wk2", "wv2", "wo2", "bo2", "n1g", "n1b",
                    "w1", "b1", "w2", "b2", "n2g", "n2b"]
    weights = [packed[k] for k in weight_order]

    inputs = [x.astype(jnp.float32), value.astype(jnp.float32),
              key.astype(jnp.float32), trg_add, src_add] + weights
    in_specs = [batched(a) for a in inputs[:5]] + [shared(a) for a in weights]

    return pl.pallas_call(
        _decoder_block_kernel,
        out_shape=jax.ShapeDtypeStruct((N, L, E), jnp.float32),
        grid=grid,
        in_specs=in_specs,
        out_specs=pl.BlockSpec((bblk, L, E), lambda i: (i, 0, 0)),
        compiler_params=pltpu.CompilerParams(
            dimension_semantics=("parallel",)),
    )(*inputs)


# ----------------------------------------------------------------------------
# Pure-JAX reference (mirrors the PyTorch forward exactly) for self-check
# ----------------------------------------------------------------------------
def _ref_self_attn(v, k, q, mask, wv, wk, wq, wo, bo):
    N, Lq, E = q.shape
    Lk = k.shape[1]
    D = E // HEADS
    vh = jnp.einsum("nlhd,ed->nlhe", v.reshape(N, Lk, HEADS, D), wv)
    kh = jnp.einsum("nlhd,ed->nlhe", k.reshape(N, Lk, HEADS, D), wk)
    qh = jnp.einsum("nlhd,ed->nlhe", q.reshape(N, Lq, HEADS, D), wq)
    energy = jnp.einsum("nqhd,nkhd->nhqk", qh, kh)
    energy = jnp.where(mask == 0, -1e20, energy)
    attn = jax.nn.softmax(energy / jnp.sqrt(jnp.float32(E)), axis=3)
    out = jnp.einsum("nhql,nlhd->nqhd", attn, vh).reshape(N, Lq, E)
    return out @ wo.T + bo


def _ref_ln(y, g, b):
    mu = y.mean(-1, keepdims=True)
    var = ((y - mu) ** 2).mean(-1, keepdims=True)
    return (y - mu) / jnp.sqrt(var + LN_EPS) * g + b


def decoder_block_ref(x, value, key, src_mask, trg_mask, p):
    a1 = _ref_self_attn(x, x, x, trg_mask, p["wv1"], p["wk1"], p["wq1"],
                        p["wo1"], p["bo1"])
    query = _ref_ln(a1 + x, p["ng"], p["nb"])
    a2 = _ref_self_attn(value, key, query, src_mask, p["wv2"], p["wk2"],
                        p["wq2"], p["wo2"], p["bo2"])
    x2 = _ref_ln(a2 + query, p["n1g"], p["n1b"])
    ff = jnp.maximum(x2 @ p["w1"].T + p["b1"], 0.0) @ p["w2"].T + p["b2"]
    return _ref_ln(ff + x2, p["n2g"], p["n2b"])


def init_params(key):
    ks = jax.random.split(key, 12)
    n = lambda k, shp: (0.02 * jax.random.normal(k, shp)).astype(jnp.float32)
    D, E, H = HEAD_DIM, EMBED, HIDDEN
    return {
        # decoder self-attention
        "wq1": n(ks[0], (D, D)), "wk1": n(ks[1], (D, D)), "wv1": n(ks[2], (D, D)),
        "wo1": n(ks[3], (E, E)), "bo1": jnp.zeros((1, E), jnp.float32),
        "ng": jnp.ones((1, E), jnp.float32), "nb": jnp.zeros((1, E), jnp.float32),
        # transformer-block cross-attention
        "wq2": n(ks[4], (D, D)), "wk2": n(ks[5], (D, D)), "wv2": n(ks[6], (D, D)),
        "wo2": n(ks[7], (E, E)), "bo2": jnp.zeros((1, E), jnp.float32),
        "n1g": jnp.ones((1, E), jnp.float32), "n1b": jnp.zeros((1, E), jnp.float32),
        # feed-forward
        "w1": n(ks[8], (H, E)), "b1": n(ks[9], (1, H)),
        "w2": n(ks[10], (E, H)), "b2": n(ks[11], (1, E)),
        "n2g": jnp.ones((1, E), jnp.float32), "n2b": jnp.zeros((1, E), jnp.float32),
    }


if __name__ == "__main__":
    N, L = 2, 8
    root = jax.random.PRNGKey(0)
    kx, kv, kk, kp = jax.random.split(root, 4)

    x = jax.random.normal(kx, (N, L, EMBED), dtype=jnp.float32)
    value = jax.random.normal(kv, (N, L, EMBED), dtype=jnp.float32)
    key_ = jax.random.normal(kk, (N, L, EMBED), dtype=jnp.float32)

    # causal target mask, all-ones source mask (shape (N,1,Lq,Lk))
    trg_mask = jnp.broadcast_to(
        jnp.tril(jnp.ones((L, L), jnp.float32))[None, None], (N, 1, L, L))
    src_mask = jnp.ones((N, 1, L, L), jnp.float32)

    params = init_params(kp)
    packed = pack_params(params)   # weight packing hoisted out of the call path

    out = decoder_block(x, value, key_, src_mask, trg_mask, packed)
    out = jax.block_until_ready(out)

    ref = decoder_block_ref(x, value, key_, src_mask, trg_mask, params)
    assert out.shape == (N, L, EMBED)
    # Tolerance 2e-3: the softmax denominator uses the EUP approximate
    # reciprocal (pl.reciprocal(approx=True)); everything else is exact f32.
    max_err = float(jnp.max(jnp.abs(out - ref)))
    assert jnp.allclose(out, ref, atol=2e-3, rtol=2e-3), (
        f"mismatch vs reference, max abs err = {max_err}")

    print("KERNEL_OK")
</pallas_src>

<mosaic_0001>
module attributes {stable_mosaic.version = 11 : i64} {
  func.func @_decoder_block_kernel(%arg0: i32, %arg1: memref<1x8x32xf32, #tpu.memory_space<vmem>>, %arg2: memref<1x8x32xf32, #tpu.memory_space<vmem>>, %arg3: memref<1x8x32xf32, #tpu.memory_space<vmem>>, %arg4: memref<1x8x8xf32, #tpu.memory_space<vmem>>, %arg5: memref<1x8x8xf32, #tpu.memory_space<vmem>>, %arg6: memref<32x96xf32, #tpu.memory_space<vmem>>, %arg7: memref<32x32xf32, #tpu.memory_space<vmem>>, %arg8: memref<1x32xf32, #tpu.memory_space<vmem>>, %arg9: memref<1x32xf32, #tpu.memory_space<vmem>>, %arg10: memref<1x32xf32, #tpu.memory_space<vmem>>, %arg11: memref<32x32xf32, #tpu.memory_space<vmem>>, %arg12: memref<32x32xf32, #tpu.memory_space<vmem>>, %arg13: memref<32x32xf32, #tpu.memory_space<vmem>>, %arg14: memref<32x32xf32, #tpu.memory_space<vmem>>, %arg15: memref<1x32xf32, #tpu.memory_space<vmem>>, %arg16: memref<1x32xf32, #tpu.memory_space<vmem>>, %arg17: memref<1x32xf32, #tpu.memory_space<vmem>>, %arg18: memref<32x128xf32, #tpu.memory_space<vmem>>, %arg19: memref<1x128xf32, #tpu.memory_space<vmem>>, %arg20: memref<128x32xf32, #tpu.memory_space<vmem>>, %arg21: memref<1x32xf32, #tpu.memory_space<vmem>>, %arg22: memref<1x32xf32, #tpu.memory_space<vmem>>, %arg23: memref<1x32xf32, #tpu.memory_space<vmem>>, %arg24: memref<1x8x32xf32, #tpu.memory_space<vmem>>) attributes {dimension_semantics = [#tpu.dimension_semantics<parallel>], iteration_bounds = array<i64: 2>, scalar_prefetch = 0 : i64, scratch_operands = 0 : i64, tpu.core_type = #tpu.core_type<tc>, window_params = [{transform_indices = @transform_0, window_bounds = array<i64: 1, 8, 32>}, {transform_indices = @transform_1, window_bounds = array<i64: 1, 8, 32>}, {transform_indices = @transform_2, window_bounds = array<i64: 1, 8, 32>}, {transform_indices = @transform_3, window_bounds = array<i64: 1, 8, 8>}, {transform_indices = @transform_4, window_bounds = array<i64: 1, 8, 8>}, {pipeline_mode = #tpu.pipeline_mode<synchronous>, transform_indices = @transform_5, window_bounds = array<i64: 32, 96>}, {pipeline_mode = #tpu.pipeline_mode<synchronous>, transform_indices = @transform_6, window_bounds = array<i64: 32, 32>}, {pipeline_mode = #tpu.pipeline_mode<synchronous>, transform_indices = @transform_7, window_bounds = array<i64: 1, 32>}, {pipeline_mode = #tpu.pipeline_mode<synchronous>, transform_indices = @transform_8, window_bounds = array<i64: 1, 32>}, {pipeline_mode = #tpu.pipeline_mode<synchronous>, transform_indices = @transform_9, window_bounds = array<i64: 1, 32>}, {pipeline_mode = #tpu.pipeline_mode<synchronous>, transform_indices = @transform_10, window_bounds = array<i64: 32, 32>}, {pipeline_mode = #tpu.pipeline_mode<synchronous>, transform_indices = @transform_11, window_bounds = array<i64: 32, 32>}, {pipeline_mode = #tpu.pipeline_mode<synchronous>, transform_indices = @transform_12, window_bounds = array<i64: 32, 32>}, {pipeline_mode = #tpu.pipeline_mode<synchronous>, transform_indices = @transform_13, window_bounds = array<i64: 32, 32>}, {pipeline_mode = #tpu.pipeline_mode<synchronous>, transform_indices = @transform_14, window_bounds = array<i64: 1, 32>}, {pipeline_mode = #tpu.pipeline_mode<synchronous>, transform_indices = @transform_15, window_bounds = array<i64: 1, 32>}, {pipeline_mode = #tpu.pipeline_mode<synchronous>, transform_indices = @transform_16, window_bounds = array<i64: 1, 32>}, {pipeline_mode = #tpu.pipeline_mode<synchronous>, transform_indices = @transform_17, window_bounds = array<i64: 32, 128>}, {pipeline_mode = #tpu.pipeline_mode<synchronous>, transform_indices = @transform_18, window_bounds = array<i64: 1, 128>}, {pipeline_mode = #tpu.pipeline_mode<synchronous>, transform_indices = @transform_19, window_bounds = array<i64: 128, 32>}, {pipeline_mode = #tpu.pipeline_mode<synchronous>, transform_indices = @transform_20, window_bounds = array<i64: 1, 32>}, {pipeline_mode = #tpu.pipeline_mode<synchronous>, transform_indices = @transform_21, window_bounds = array<i64: 1, 32>}, {pipeline_mode = #tpu.pipeline_mode<synchronous>, transform_indices = @transform_22, window_bounds = array<i64: 1, 32>}, {transform_indices = @transform_23, window_bounds = array<i64: 1, 8, 32>}]} {
    %c0 = arith.constant 0 : index
    %c0_0 = arith.constant 0 : index
    %c0_1 = arith.constant 0 : index
    %0 = vector.load %arg1[%c0, %c0_0, %c0_1] : memref<1x8x32xf32, #tpu.memory_space<vmem>>, vector<1x8x32xf32>
    %1 = vector.shape_cast %0 : vector<1x8x32xf32> to vector<8x32xf32>
    %c0_2 = arith.constant 0 : index
    %c0_3 = arith.constant 0 : index
    %c0_4 = arith.constant 0 : index
    %2 = vector.load %arg2[%c0_2, %c0_3, %c0_4] : memref<1x8x32xf32, #tpu.memory_space<vmem>>, vector<1x8x32xf32>
    %3 = vector.shape_cast %2 : vector<1x8x32xf32> to vector<8x32xf32>
    %c0_5 = arith.constant 0 : index
    %c0_6 = arith.constant 0 : index
    %c0_7 = arith.constant 0 : index
    %4 = vector.load %arg3[%c0_5, %c0_6, %c0_7] : memref<1x8x32xf32, #tpu.memory_space<vmem>>, vector<1x8x32xf32>
    %5 = vector.shape_cast %4 : vector<1x8x32xf32> to vector<8x32xf32>
    %c0_8 = arith.constant 0 : index
    %c0_9 = arith.constant 0 : index
    %6 = vector.load %arg6[%c0_8, %c0_9] : memref<32x96xf32, #tpu.memory_space<vmem>>, vector<32x96xf32>
    %cst = arith.constant dense<0.000000e+00> : vector<8x96xf32>
    %7 = tpu.matmul %1, %6, %cst {dimension_numbers = #tpu.dot_dimension_numbers<[1], [0], [0], [1], [0, 0, 1, 1], [], []>} : vector<8x32xf32>, vector<32x96xf32>, vector<8x96xf32> -> vector<8x96xf32>
    %8 = vector.extract_strided_slice %7 {offsets = [0, 0], sizes = [8, 32], strides = [1, 1]} : vector<8x96xf32> to vector<8x32xf32>
    %9 = vector.extract_strided_slice %7 {offsets = [0, 32], sizes = [8, 32], strides = [1, 1]} : vector<8x96xf32> to vector<8x32xf32>
    %10 = vector.extract_strided_slice %7 {offsets = [0, 64], sizes = [8, 32], strides = [1, 1]} : vector<8x96xf32> to vector<8x32xf32>
    %c0_10 = arith.constant 0 : index
    %c0_11 = arith.constant 0 : index
    %11 = vector.load %arg7[%c0_10, %c0_11] : memref<32x32xf32, #tpu.memory_space<vmem>>, vector<32x32xf32>
    %c0_12 = arith.constant 0 : index
    %c0_13 = arith.constant 0 : index
    %12 = vector.load %arg8[%c0_12, %c0_13] : memref<1x32xf32, #tpu.memory_space<vmem>>, vector<1x32xf32>
    %c0_14 = arith.constant 0 : index
    %c0_15 = arith.constant 0 : index
    %c0_16 = arith.constant 0 : index
    %13 = vector.load %arg4[%c0_14, %c0_15, %c0_16] : memref<1x8x8xf32, #tpu.memory_space<vmem>>, vector<1x8x8xf32>
    %14 = vector.shape_cast %13 : vector<1x8x8xf32> to vector<8x8xf32>
    %15 = vector.extract_strided_slice %8 {offsets = [0, 0], sizes = [8, 8], strides = [1, 1]} : vector<8x32xf32> to vector<8x8xf32>
    %16 = vector.extract_strided_slice %9 {offsets = [0, 0], sizes = [8, 8], strides = [1, 1]} : vector<8x32xf32> to vector<8x8xf32>
    %cst_17 = arith.constant dense<0.000000e+00> : vector<8x8xf32>
    %17 = tpu.matmul %15, %16, %cst_17 {dimension_numbers = #tpu.dot_dimension_numbers<[1], [1], [0], [0], [0, 0, 1, 0], [], []>} : vector<8x8xf32>, vector<8x8xf32>, vector<8x8xf32> -> vector<8x8xf32>
    %18 = arith.addf %17, %14 : vector<8x8xf32>
    %cst_18 = arith.constant dense<0xFF800000> : vector<8xf32>
    %19 = vector.multi_reduction <maximumf>, %18, %cst_18 [1] : vector<8x8xf32> to vector<8xf32>
    %20 = vector.shape_cast %19 : vector<8xf32> to vector<8x1xf32>
    %21 = vector.broadcast %20 : vector<8x1xf32> to vector<8x8xf32>
    %22 = arith.subf %18, %21 : vector<8x8xf32>
    %23 = math.exp %22 : vector<8x8xf32>
    %cst_19 = arith.constant dense<0.000000e+00> : vector<8xf32>
    %24 = vector.multi_reduction <add>, %23, %cst_19 [1] : vector<8x8xf32> to vector<8xf32>
    %25 = vector.shape_cast %24 : vector<8xf32> to vector<8x1xf32>
    %26 = tpu.reciprocal %25 {approx = true} : vector<8x1xf32> -> vector<8x1xf32>
    %27 = vector.broadcast %26 : vector<8x1xf32> to vector<8x8xf32>
    %28 = arith.mulf %23, %27 : vector<8x8xf32>
    %29 = vector.extract_strided_slice %10 {offsets = [0, 0], sizes = [8, 8], strides = [1, 1]} : vector<8x32xf32> to vector<8x8xf32>
    %cst_20 = arith.constant dense<0.000000e+00> : vector<8x8xf32>
    %30 = tpu.matmul %28, %29, %cst_20 {dimension_numbers = #tpu.dot_dimension_numbers<[1], [0], [0], [1], [0, 0, 1, 1], [], []>} : vector<8x8xf32>, vector<8x8xf32>, vector<8x8xf32> -> vector<8x8xf32>
    %31 = vector.extract_strided_slice %8 {offsets = [0, 8], sizes = [8, 8], strides = [1, 1]} : vector<8x32xf32> to vector<8x8xf32>
    %32 = vector.extract_strided_slice %9 {offsets = [0, 8], sizes = [8, 8], strides = [1, 1]} : vector<8x32xf32> to vector<8x8xf32>
    %cst_21 = arith.constant dense<0.000000e+00> : vector<8x8xf32>
    %33 = tpu.matmul %31, %32, %cst_21 {dimension_numbers = #tpu.dot_dimension_numbers<[1], [1], [0], [0], [0, 0, 1, 0], [], []>} : vector<8x8xf32>, vector<8x8xf32>, vector<8x8xf32> -> vector<8x8xf32>
    %34 = arith.addf %33, %14 : vector<8x8xf32>
    %cst_22 = arith.constant dense<0xFF800000> : vector<8xf32>
    %35 = vector.multi_reduction <maximumf>, %34, %cst_22 [1] : vector<8x8xf32> to vector<8xf32>
    %36 = vector.shape_cast %35 : vector<8xf32> to vector<8x1xf32>
    %37 = vector.broadcast %36 : vector<8x1xf32> to vector<8x8xf32>
    %38 = arith.subf %34, %37 : vector<8x8xf32>
    %39 = math.exp %38 : vector<8x8xf32>
    %cst_23 = arith.constant dense<0.000000e+00> : vector<8xf32>
    %40 = vector.multi_reduction <add>, %39, %cst_23 [1] : vector<8x8xf32> to vector<8xf32>
    %41 = vector.shape_cast %40 : vector<8xf32> to vector<8x1xf32>
    %42 = tpu.reciprocal %41 {approx = true} : vector<8x1xf32> -> vector<8x1xf32>
    %43 = vector.broadcast %42 : vector<8x1xf32> to vector<8x8xf32>
    %44 = arith.mulf %39, %43 : vector<8x8xf32>
    %45 = vector.extract_strided_slice %10 {offsets = [0, 8], sizes = [8, 8], strides = [1, 1]} : vector<8x32xf32> to vector<8x8xf32>
    %cst_24 = arith.constant dense<0.000000e+00> : vector<8x8xf32>
    %46 = tpu.matmul %44, %45, %cst_24 {dimension_numbers = #tpu.dot_dimension_numbers<[1], [0], [0], [1], [0, 0, 1, 1], [], []>} : vector<8x8xf32>, vector<8x8xf32>, vector<8x8xf32> -> vector<8x8xf32>
    %47 = vector.extract_strided_slice %8 {offsets = [0, 16], sizes = [8, 8], strides = [1, 1]} : vector<8x32xf32> to vector<8x8xf32>
    %48 = vector.extract_strided_slice %9 {offsets = [0, 16], sizes = [8, 8], strides = [1, 1]} : vector<8x32xf32> to vector<8x8xf32>
    %cst_25 = arith.constant dense<0.000000e+00> : vector<8x8xf32>
    %49 = tpu.matmul %47, %48, %cst_25 {dimension_numbers = #tpu.dot_dimension_numbers<[1], [1], [0], [0], [0, 0, 1, 0], [], []>} : vector<8x8xf32>, vector<8x8xf32>, vector<8x8xf32> -> vector<8x8xf32>
    %50 = arith.addf %49, %14 : vector<8x8xf32>
    %cst_26 = arith.constant dense<0xFF800000> : vector<8xf32>
    %51 = vector.multi_reduction <maximumf>, %50, %cst_26 [1] : vector<8x8xf32> to vector<8xf32>
    %52 = vector.shape_cast %51 : vector<8xf32> to vector<8x1xf32>
    %53 = vector.broadcast %52 : vector<8x1xf32> to vector<8x8xf32>
    %54 = arith.subf %50, %53 : vector<8x8xf32>
    %55 = math.exp %54 : vector<8x8xf32>
    %cst_27 = arith.constant dense<0.000000e+00> : vector<8xf32>
    %56 = vector.multi_reduction <add>, %55, %cst_27 [1] : vector<8x8xf32> to vector<8xf32>
    %57 = vector.shape_cast %56 : vector<8xf32> to vector<8x1xf32>
    %58 = tpu.reciprocal %57 {approx = true} : vector<8x1xf32> -> vector<8x1xf32>
    %59 = vector.broadcast %58 : vector<8x1xf32> to vector<8x8xf32>
    %60 = arith.mulf %55, %59 : vector<8x8xf32>
    %61 = vector.extract_strided_slice %10 {offsets = [0, 16], sizes = [8, 8], strides = [1, 1]} : vector<8x32xf32> to vector<8x8xf32>
    %cst_28 = arith.constant dense<0.000000e+00> : vector<8x8xf32>
    %62 = tpu.matmul %60, %61, %cst_28 {dimension_numbers = #tpu.dot_dimension_numbers<[1], [0], [0], [1], [0, 0, 1, 1], [], []>} : vector<8x8xf32>, vector<8x8xf32>, vector<8x8xf32> -> vector<8x8xf32>
    %63 = vector.extract_strided_slice %8 {offsets = [0, 24], sizes = [8, 8], strides = [1, 1]} : vector<8x32xf32> to vector<8x8xf32>
    %64 = vector.extract_strided_slice %9 {offsets = [0, 24], sizes = [8, 8], strides = [1, 1]} : vector<8x32xf32> to vector<8x8xf32>
    %cst_29 = arith.constant dense<0.000000e+00> : vector<8x8xf32>
    %65 = tpu.matmul %63, %64, %cst_29 {dimension_numbers = #tpu.dot_dimension_numbers<[1], [1], [0], [0], [0, 0, 1, 0], [], []>} : vector<8x8xf32>, vector<8x8xf32>, vector<8x8xf32> -> vector<8x8xf32>
    %66 = arith.addf %65, %14 : vector<8x8xf32>
    %cst_30 = arith.constant dense<0xFF800000> : vector<8xf32>
    %67 = vector.multi_reduction <maximumf>, %66, %cst_30 [1] : vector<8x8xf32> to vector<8xf32>
    %68 = vector.shape_cast %67 : vector<8xf32> to vector<8x1xf32>
    %69 = vector.broadcast %68 : vector<8x1xf32> to vector<8x8xf32>
    %70 = arith.subf %66, %69 : vector<8x8xf32>
    %71 = math.exp %70 : vector<8x8xf32>
    %cst_31 = arith.constant dense<0.000000e+00> : vector<8xf32>
    %72 = vector.multi_reduction <add>, %71, %cst_31 [1] : vector<8x8xf32> to vector<8xf32>
    %73 = vector.shape_cast %72 : vector<8xf32> to vector<8x1xf32>
    %74 = tpu.reciprocal %73 {approx = true} : vector<8x1xf32> -> vector<8x1xf32>
    %75 = vector.broadcast %74 : vector<8x1xf32> to vector<8x8xf32>
    %76 = arith.mulf %71, %75 : vector<8x8xf32>
    %77 = vector.extract_strided_slice %10 {offsets = [0, 24], sizes = [8, 8], strides = [1, 1]} : vector<8x32xf32> to vector<8x8xf32>
    %cst_32 = arith.constant dense<0.000000e+00> : vector<8x8xf32>
    %78 = tpu.matmul %76, %77, %cst_32 {dimension_numbers = #tpu.dot_dimension_numbers<[1], [0], [0], [1], [0, 0, 1, 1], [], []>} : vector<8x8xf32>, vector<8x8xf32>, vector<8x8xf32> -> vector<8x8xf32>
    %79 = tpu.concatenate %30, %46, %62, %78 in 1 : vector<8x8xf32>, vector<8x8xf32>, vector<8x8xf32>, vector<8x8xf32> -> vector<8x32xf32>
    %cst_33 = arith.constant dense<0.000000e+00> : vector<8x32xf32>
    %80 = tpu.matmul %79, %11, %cst_33 {dimension_numbers = #tpu.dot_dimension_numbers<[1], [0], [0], [1], [0, 0, 1, 1], [], []>} : vector<8x32xf32>, vector<32x32xf32>, vector<8x32xf32> -> vector<8x32xf32>
    %81 = vector.broadcast %12 : vector<1x32xf32> to vector<8x32xf32>
    %82 = arith.addf %80, %81 : vector<8x32xf32>
    %83 = arith.addf %82, %1 : vector<8x32xf32>
    %c0_34 = arith.constant 0 : index
    %c0_35 = arith.constant 0 : index
    %84 = vector.load %arg9[%c0_34, %c0_35] : memref<1x32xf32, #tpu.memory_space<vmem>>, vector<1x32xf32>
    %c0_36 = arith.constant 0 : index
    %c0_37 = arith.constant 0 : index
    %85 = vector.load %arg10[%c0_36, %c0_37] : memref<1x32xf32, #tpu.memory_space<vmem>>, vector<1x32xf32>
    %cst_38 = arith.constant dense<0.000000e+00> : vector<8xf32>
    %86 = vector.multi_reduction <add>, %83, %cst_38 [1] : vector<8x32xf32> to vector<8xf32>
    %87 = vector.shape_cast %86 : vector<8xf32> to vector<8x1xf32>
    %cst_39 = arith.constant 3.200000e+01 : f32
    %88 = vector.broadcast %cst_39 : f32 to vector<8x1xf32>
    %89 = arith.divf %87, %88 : vector<8x1xf32>
    %90 = vector.broadcast %89 : vector<8x1xf32> to vector<8x32xf32>
    %91 = arith.subf %83, %90 : vector<8x32xf32>
    %92 = arith.mulf %91, %91 : vector<8x32xf32>
    %cst_40 = arith.constant dense<0.000000e+00> : vector<8xf32>
    %93 = vector.multi_reduction <add>, %92, %cst_40 [1] : vector<8x32xf32> to vector<8xf32>
    %94 = vector.shape_cast %93 : vector<8xf32> to vector<8x1xf32>
    %cst_41 = arith.constant 3.200000e+01 : f32
    %95 = vector.broadcast %cst_41 : f32 to vector<8x1xf32>
    %96 = arith.divf %94, %95 : vector<8x1xf32>
    %97 = vector.broadcast %89 : vector<8x1xf32> to vector<8x32xf32>
    %98 = arith.subf %83, %97 : vector<8x32xf32>
    %cst_42 = arith.constant 9.99999974E-6 : f32
    %99 = vector.broadcast %cst_42 : f32 to vector<8x1xf32>
    %100 = arith.addf %96, %99 : vector<8x1xf32>
    %101 = math.rsqrt %100 : vector<8x1xf32>
    %102 = vector.broadcast %101 : vector<8x1xf32> to vector<8x32xf32>
    %103 = arith.mulf %98, %102 : vector<8x32xf32>
    %104 = vector.broadcast %84 : vector<1x32xf32> to vector<8x32xf32>
    %105 = arith.mulf %103, %104 : vector<8x32xf32>
    %106 = vector.broadcast %85 : vector<1x32xf32> to vector<8x32xf32>
    %107 = arith.addf %105, %106 : vector<8x32xf32>
    %c0_43 = arith.constant 0 : index
    %c0_44 = arith.constant 0 : index
    %108 = vector.load %arg11[%c0_43, %c0_44] : memref<32x32xf32, #tpu.memory_space<vmem>>, vector<32x32xf32>
    %cst_45 = arith.constant dense<0.000000e+00> : vector<8x32xf32>
    %109 = tpu.matmul %107, %108, %cst_45 {dimension_numbers = #tpu.dot_dimension_numbers<[1], [0], [0], [1], [0, 0, 1, 1], [], []>} : vector<8x32xf32>, vector<32x32xf32>, vector<8x32xf32> -> vector<8x32xf32>
    %c0_46 = arith.constant 0 : index
    %c0_47 = arith.constant 0 : index
    %110 = vector.load %arg12[%c0_46, %c0_47] : memref<32x32xf32, #tpu.memory_space<vmem>>, vector<32x32xf32>
    %cst_48 = arith.constant dense<0.000000e+00> : vector<8x32xf32>
    %111 = tpu.matmul %5, %110, %cst_48 {dimension_numbers = #tpu.dot_dimension_numbers<[1], [0], [0], [1], [0, 0, 1, 1], [], []>} : vector<8x32xf32>, vector<32x32xf32>, vector<8x32xf32> -> vector<8x32xf32>
    %c0_49 = arith.constant 0 : index
    %c0_50 = arith.constant 0 : index
    %112 = vector.load %arg13[%c0_49, %c0_50] : memref<32x32xf32, #tpu.memory_space<vmem>>, vector<32x32xf32>
    %cst_51 = arith.constant dense<0.000000e+00> : vector<8x32xf32>
    %113 = tpu.matmul %3, %112, %cst_51 {dimension_numbers = #tpu.dot_dimension_numbers<[1], [0], [0], [1], [0, 0, 1, 1], [], []>} : vector<8x32xf32>, vector<32x32xf32>, vector<8x32xf32> -> vector<8x32xf32>
    %c0_52 = arith.constant 0 : index
    %c0_53 = arith.constant 0 : index
    %114 = vector.load %arg14[%c0_52, %c0_53] : memref<32x32xf32, #tpu.memory_space<vmem>>, vector<32x32xf32>
    %c0_54 = arith.constant 0 : index
    %c0_55 = arith.constant 0 : index
    %115 = vector.load %arg15[%c0_54, %c0_55] : memref<1x32xf32, #tpu.memory_space<vmem>>, vector<1x32xf32>
    %c0_56 = arith.constant 0 : index
    %c0_57 = arith.constant 0 : index
    %c0_58 = arith.constant 0 : index
    %116 = vector.load %arg5[%c0_56, %c0_57, %c0_58] : memref<1x8x8xf32, #tpu.memory_space<vmem>>, vector<1x8x8xf32>
    %117 = vector.shape_cast %116 : vector<1x8x8xf32> to vector<8x8xf32>
    %118 = vector.extract_strided_slice %109 {offsets = [0, 0], sizes = [8, 8], strides = [1, 1]} : vector<8x32xf32> to vector<8x8xf32>
    %119 = vector.extract_strided_slice %111 {offsets = [0, 0], sizes = [8, 8], strides = [1, 1]} : vector<8x32xf32> to vector<8x8xf32>
    %cst_59 = arith.constant dense<0.000000e+00> : vector<8x8xf32>
    %120 = tpu.matmul %118, %119, %cst_59 {dimension_numbers = #tpu.dot_dimension_numbers<[1], [1], [0], [0], [0, 0, 1, 0], [], []>} : vector<8x8xf32>, vector<8x8xf32>, vector<8x8xf32> -> vector<8x8xf32>
    %121 = arith.addf %120, %117 : vector<8x8xf32>
    %cst_60 = arith.constant dense<0xFF800000> : vector<8xf32>
    %122 = vector.multi_reduction <maximumf>, %121, %cst_60 [1] : vector<8x8xf32> to vector<8xf32>
    %123 = vector.shape_cast %122 : vector<8xf32> to vector<8x1xf32>
    %124 = vector.broadcast %123 : vector<8x1xf32> to vector<8x8xf32>
    %125 = arith.subf %121, %124 : vector<8x8xf32>
    %126 = math.exp %125 : vector<8x8xf32>
    %cst_61 = arith.constant dense<0.000000e+00> : vector<8xf32>
    %127 = vector.multi_reduction <add>, %126, %cst_61 [1] : vector<8x8xf32> to vector<8xf32>
    %128 = vector.shape_cast %127 : vector<8xf32> to vector<8x1xf32>
    %129 = tpu.reciprocal %128 {approx = true} : vector<8x1xf32> -> vector<8x1xf32>
    %130 = vector.broadcast %129 : vector<8x1xf32> to vector<8x8xf32>
    %131 = arith.mulf %126, %130 : vector<8x8xf32>
    %132 = vector.extract_strided_slice %113 {offsets = [0, 0], sizes = [8, 8], strides = [1, 1]} : vector<8x32xf32> to vector<8x8xf32>
    %cst_62 = arith.constant dense<0.000000e+00> : vector<8x8xf32>
    %133 = tpu.matmul %131, %132, %cst_62 {dimension_numbers = #tpu.dot_dimension_numbers<[1], [0], [0], [1], [0, 0, 1, 1], [], []>} : vector<8x8xf32>, vector<8x8xf32>, vector<8x8xf32> -> vector<8x8xf32>
    %134 = vector.extract_strided_slice %109 {offsets = [0, 8], sizes = [8, 8], strides = [1, 1]} : vector<8x32xf32> to vector<8x8xf32>
    %135 = vector.extract_strided_slice %111 {offsets = [0, 8], sizes = [8, 8], strides = [1, 1]} : vector<8x32xf32> to vector<8x8xf32>
    %cst_63 = arith.constant dense<0.000000e+00> : vector<8x8xf32>
    %136 = tpu.matmul %134, %135, %cst_63 {dimension_numbers = #tpu.dot_dimension_numbers<[1], [1], [0], [0], [0, 0, 1, 0], [], []>} : vector<8x8xf32>, vector<8x8xf32>, vector<8x8xf32> -> vector<8x8xf32>
    %137 = arith.addf %136, %117 : vector<8x8xf32>
    %cst_64 = arith.constant dense<0xFF800000> : vector<8xf32>
    %138 = vector.multi_reduction <maximumf>, %137, %cst_64 [1] : vector<8x8xf32> to vector<8xf32>
    %139 = vector.shape_cast %138 : vector<8xf32> to vector<8x1xf32>
    %140 = vector.broadcast %139 : vector<8x1xf32> to vector<8x8xf32>
    %141 = arith.subf %137, %140 : vector<8x8xf32>
    %142 = math.exp %141 : vector<8x8xf32>
    %cst_65 = arith.constant dense<0.000000e+00> : vector<8xf32>
    %143 = vector.multi_reduction <add>, %142, %cst_65 [1] : vector<8x8xf32> to vector<8xf32>
    %144 = vector.shape_cast %143 : vector<8xf32> to vector<8x1xf32>
    %145 = tpu.reciprocal %144 {approx = true} : vector<8x1xf32> -> vector<8x1xf32>
    %146 = vector.broadcast %145 : vector<8x1xf32> to vector<8x8xf32>
    %147 = arith.mulf %142, %146 : vector<8x8xf32>
    %148 = vector.extract_strided_slice %113 {offsets = [0, 8], sizes = [8, 8], strides = [1, 1]} : vector<8x32xf32> to vector<8x8xf32>
    %cst_66 = arith.constant dense<0.000000e+00> : vector<8x8xf32>
    %149 = tpu.matmul %147, %148, %cst_66 {dimension_numbers = #tpu.dot_dimension_numbers<[1], [0], [0], [1], [0, 0, 1, 1], [], []>} : vector<8x8xf32>, vector<8x8xf32>, vector<8x8xf32> -> vector<8x8xf32>
    %150 = vector.extract_strided_slice %109 {offsets = [0, 16], sizes = [8, 8], strides = [1, 1]} : vector<8x32xf32> to vector<8x8xf32>
    %151 = vector.extract_strided_slice %111 {offsets = [0, 16], sizes = [8, 8], strides = [1, 1]} : vector<8x32xf32> to vector<8x8xf32>
    %cst_67 = arith.constant dense<0.000000e+00> : vector<8x8xf32>
    %152 = tpu.matmul %150, %151, %cst_67 {dimension_numbers = #tpu.dot_dimension_numbers<[1], [1], [0], [0], [0, 0, 1, 0], [], []>} : vector<8x8xf32>, vector<8x8xf32>, vector<8x8xf32> -> vector<8x8xf32>
    %153 = arith.addf %152, %117 : vector<8x8xf32>
    %cst_68 = arith.constant dense<0xFF800000> : vector<8xf32>
    %154 = vector.multi_reduction <maximumf>, %153, %cst_68 [1] : vector<8x8xf32> to vector<8xf32>
    %155 = vector.shape_cast %154 : vector<8xf32> to vector<8x1xf32>
    %156 = vector.broadcast %155 : vector<8x1xf32> to vector<8x8xf32>
    %157 = arith.subf %153, %156 : vector<8x8xf32>
    %158 = math.exp %157 : vector<8x8xf32>
    %cst_69 = arith.constant dense<0.000000e+00> : vector<8xf32>
    %159 = vector.multi_reduction <add>, %158, %cst_69 [1] : vector<8x8xf32> to vector<8xf32>
    %160 = vector.shape_cast %159 : vector<8xf32> to vector<8x1xf32>
    %161 = tpu.reciprocal %160 {approx = true} : vector<8x1xf32> -> vector<8x1xf32>
    %162 = vector.broadcast %161 : vector<8x1xf32> to vector<8x8xf32>
    %163 = arith.mulf %158, %162 : vector<8x8xf32>
    %164 = vector.extract_strided_slice %113 {offsets = [0, 16], sizes = [8, 8], strides = [1, 1]} : vector<8x32xf32> to vector<8x8xf32>
    %cst_70 = arith.constant dense<0.000000e+00> : vector<8x8xf32>
    %165 = tpu.matmul %163, %164, %cst_70 {dimension_numbers = #tpu.dot_dimension_numbers<[1], [0], [0], [1], [0, 0, 1, 1], [], []>} : vector<8x8xf32>, vector<8x8xf32>, vector<8x8xf32> -> vector<8x8xf32>
    %166 = vector.extract_strided_slice %109 {offsets = [0, 24], sizes = [8, 8], strides = [1, 1]} : vector<8x32xf32> to vector<8x8xf32>
    %167 = vector.extract_strided_slice %111 {offsets = [0, 24], sizes = [8, 8], strides = [1, 1]} : vector<8x32xf32> to vector<8x8xf32>
    %cst_71 = arith.constant dense<0.000000e+00> : vector<8x8xf32>
    %168 = tpu.matmul %166, %167, %cst_71 {dimension_numbers = #tpu.dot_dimension_numbers<[1], [1], [0], [0], [0, 0, 1, 0], [], []>} : vector<8x8xf32>, vector<8x8xf32>, vector<8x8xf32> -> vector<8x8xf32>
    %169 = arith.addf %168, %117 : vector<8x8xf32>
    %cst_72 = arith.constant dense<0xFF800000> : vector<8xf32>
    %170 = vector.multi_reduction <maximumf>, %169, %cst_72 [1] : vector<8x8xf32> to vector<8xf32>
    %171 = vector.shape_cast %170 : vector<8xf32> to vector<8x1xf32>
    %172 = vector.broadcast %171 : vector<8x1xf32> to vector<8x8xf32>
    %173 = arith.subf %169, %172 : vector<8x8xf32>
    %174 = math.exp %173 : vector<8x8xf32>
    %cst_73 = arith.constant dense<0.000000e+00> : vector<8xf32>
    %175 = vector.multi_reduction <add>, %174, %cst_73 [1] : vector<8x8xf32> to vector<8xf32>
    %176 = vector.shape_cast %175 : vector<8xf32> to vector<8x1xf32>
    %177 = tpu.reciprocal %176 {approx = true} : vector<8x1xf32> -> vector<8x1xf32>
    %178 = vector.broadcast %177 : vector<8x1xf32> to vector<8x8xf32>
    %179 = arith.mulf %174, %178 : vector<8x8xf32>
    %180 = vector.extract_strided_slice %113 {offsets = [0, 24], sizes = [8, 8], strides = [1, 1]} : vector<8x32xf32> to vector<8x8xf32>
    %cst_74 = arith.constant dense<0.000000e+00> : vector<8x8xf32>
    %181 = tpu.matmul %179, %180, %cst_74 {dimension_numbers = #tpu.dot_dimension_numbers<[1], [0], [0], [1], [0, 0, 1, 1], [], []>} : vector<8x8xf32>, vector<8x8xf32>, vector<8x8xf32> -> vector<8x8xf32>
    %182 = tpu.concatenate %133, %149, %165, %181 in 1 : vector<8x8xf32>, vector<8x8xf32>, vector<8x8xf32>, vector<8x8xf32> -> vector<8x32xf32>
    %cst_75 = arith.constant dense<0.000000e+00> : vector<8x32xf32>
    %183 = tpu.matmul %182, %114, %cst_75 {dimension_numbers = #tpu.dot_dimension_numbers<[1], [0], [0], [1], [0, 0, 1, 1], [], []>} : vector<8x32xf32>, vector<32x32xf32>, vector<8x32xf32> -> vector<8x32xf32>
    %184 = vector.broadcast %115 : vector<1x32xf32> to vector<8x32xf32>
    %185 = arith.addf %183, %184 : vector<8x32xf32>
    %186 = arith.addf %185, %107 : vector<8x32xf32>
    %c0_76 = arith.constant 0 : index
    %c0_77 = arith.constant 0 : index
    %187 = vector.load %arg16[%c0_76, %c0_77] : memref<1x32xf32, #tpu.memory_space<vmem>>, vector<1x32xf32>
    %c0_78 = arith.constant 0 : index
    %c0_79 = arith.constant 0 : index
    %188 = vector.load %arg17[%c0_78, %c0_79] : memref<1x32xf32, #tpu.memory_space<vmem>>, vector<1x32xf32>
    %cst_80 = arith.constant dense<0.000000e+00> : vector<8xf32>
    %189 = vector.multi_reduction <add>, %186, %cst_80 [1] : vector<8x32xf32> to vector<8xf32>
    %190 = vector.shape_cast %189 : vector<8xf32> to vector<8x1xf32>
    %cst_81 = arith.constant 3.200000e+01 : f32
    %191 = vector.broadcast %cst_81 : f32 to vector<8x1xf32>
    %192 = arith.divf %190, %191 : vector<8x1xf32>
    %193 = vector.broadcast %192 : vector<8x1xf32> to vector<8x32xf32>
    %194 = arith.subf %186, %193 : vector<8x32xf32>
    %195 = arith.mulf %194, %194 : vector<8x32xf32>
    %cst_82 = arith.constant dense<0.000000e+00> : vector<8xf32>
    %196 = vector.multi_reduction <add>, %195, %cst_82 [1] : vector<8x32xf32> to vector<8xf32>
    %197 = vector.shape_cast %196 : vector<8xf32> to vector<8x1xf32>
    %cst_83 = arith.constant 3.200000e+01 : f32
    %198 = vector.broadcast %cst_83 : f32 to vector<8x1xf32>
    %199 = arith.divf %197, %198 : vector<8x1xf32>
    %200 = vector.broadcast %192 : vector<8x1xf32> to vector<8x32xf32>
    %201 = arith.subf %186, %200 : vector<8x32xf32>
    %cst_84 = arith.constant 9.99999974E-6 : f32
    %202 = vector.broadcast %cst_84 : f32 to vector<8x1xf32>
    %203 = arith.addf %199, %202 : vector<8x1xf32>
    %204 = math.rsqrt %203 : vector<8x1xf32>
    %205 = vector.broadcast %204 : vector<8x1xf32> to vector<8x32xf32>
    %206 = arith.mulf %201, %205 : vector<8x32xf32>
    %207 = vector.broadcast %187 : vector<1x32xf32> to vector<8x32xf32>
    %208 = arith.mulf %206, %207 : vector<8x32xf32>
    %209 = vector.broadcast %188 : vector<1x32xf32> to vector<8x32xf32>
    %210 = arith.addf %208, %209 : vector<8x32xf32>
    %c0_85 = arith.constant 0 : index
    %c0_86 = arith.constant 0 : index
    %211 = vector.load %arg18[%c0_85, %c0_86] : memref<32x128xf32, #tpu.memory_space<vmem>>, vector<32x128xf32>
    %cst_87 = arith.constant dense<0.000000e+00> : vector<8x128xf32>
    %212 = tpu.matmul %210, %211, %cst_87 {dimension_numbers = #tpu.dot_dimension_numbers<[1], [0], [0], [1], [0, 0, 1, 1], [], []>} : vector<8x32xf32>, vector<32x128xf32>, vector<8x128xf32> -> vector<8x128xf32>
    %c0_88 = arith.constant 0 : index
    %c0_89 = arith.constant 0 : index
    %213 = vector.load %arg19[%c0_88, %c0_89] : memref<1x128xf32, #tpu.memory_space<vmem>>, vector<1x128xf32>
    %214 = vector.broadcast %213 : vector<1x128xf32> to vector<8x128xf32>
    %215 = arith.addf %212, %214 : vector<8x128xf32>
    %cst_90 = arith.constant 0.000000e+00 : f32
    %216 = vector.broadcast %cst_90 : f32 to vector<8x128xf32>
    %217 = arith.maximumf %215, %216 : vector<8x128xf32>
    %c0_91 = arith.constant 0 : index
    %c0_92 = arith.constant 0 : index
    %218 = vector.load %arg20[%c0_91, %c0_92] : memref<128x32xf32, #tpu.memory_space<vmem>>, vector<128x32xf32>
    %cst_93 = arith.constant dense<0.000000e+00> : vector<8x32xf32>
    %219 = tpu.matmul %217, %218, %cst_93 {dimension_numbers = #tpu.dot_dimension_numbers<[1], [0], [0], [1], [0, 0, 1, 1], [], []>} : vector<8x128xf32>, vector<128x32xf32>, vector<8x32xf32> -> vector<8x32xf32>
    %c0_94 = arith.constant 0 : index
    %c0_95 = arith.constant 0 : index
    %220 = vector.load %arg21[%c0_94, %c0_95] : memref<1x32xf32, #tpu.memory_space<vmem>>, vector<1x32xf32>
    %221 = vector.broadcast %220 : vector<1x32xf32> to vector<8x32xf32>
    %222 = arith.addf %219, %221 : vector<8x32xf32>
    %223 = arith.addf %222, %210 : vector<8x32xf32>
    %c0_96 = arith.constant 0 : index
    %c0_97 = arith.constant 0 : index
    %224 = vector.load %arg22[%c0_96, %c0_97] : memref<1x32xf32, #tpu.memory_space<vmem>>, vector<1x32xf32>
    %c0_98 = arith.constant 0 : index
    %c0_99 = arith.constant 0 : index
    %225 = vector.load %arg23[%c0_98, %c0_99] : memref<1x32xf32, #tpu.memory_space<vmem>>, vector<1x32xf32>
    %cst_100 = arith.constant dense<0.000000e+00> : vector<8xf32>
    %226 = vector.multi_reduction <add>, %223, %cst_100 [1] : vector<8x32xf32> to vector<8xf32>
    %227 = vector.shape_cast %226 : vector<8xf32> to vector<8x1xf32>
    %cst_101 = arith.constant 3.200000e+01 : f32
    %228 = vector.broadcast %cst_101 : f32 to vector<8x1xf32>
    %229 = arith.divf %227, %228 : vector<8x1xf32>
    %230 = vector.broadcast %229 : vector<8x1xf32> to vector<8x32xf32>
    %231 = arith.subf %223, %230 : vector<8x32xf32>
    %232 = arith.mulf %231, %231 : vector<8x32xf32>
    %cst_102 = arith.constant dense<0.000000e+00> : vector<8xf32>
    %233 = vector.multi_reduction <add>, %232, %cst_102 [1] : vector<8x32xf32> to vector<8xf32>
    %234 = vector.shape_cast %233 : vector<8xf32> to vector<8x1xf32>
    %cst_103 = arith.constant 3.200000e+01 : f32
    %235 = vector.broadcast %cst_103 : f32 to vector<8x1xf32>
    %236 = arith.divf %234, %235 : vector<8x1xf32>
    %237 = vector.broadcast %229 : vector<8x1xf32> to vector<8x32xf32>
    %238 = arith.subf %223, %237 : vector<8x32xf32>
    %cst_104 = arith.constant 9.99999974E-6 : f32
    %239 = vector.broadcast %cst_104 : f32 to vector<8x1xf32>
    %240 = arith.addf %236, %239 : vector<8x1xf32>
    %241 = math.rsqrt %240 : vector<8x1xf32>
    %242 = vector.broadcast %241 : vector<8x1xf32> to vector<8x32xf32>
    %243 = arith.mulf %238, %242 : vector<8x32xf32>
    %244 = vector.broadcast %224 : vector<1x32xf32> to vector<8x32xf32>
    %245 = arith.mulf %243, %244 : vector<8x32xf32>
    %246 = vector.broadcast %225 : vector<1x32xf32> to vector<8x32xf32>
    %247 = arith.addf %245, %246 : vector<8x32xf32>
    %248 = vector.shape_cast %247 : vector<8x32xf32> to vector<1x8x32xf32>
    %c0_105 = arith.constant 0 : index
    %c0_106 = arith.constant 0 : index
    %c0_107 = arith.constant 0 : index
    %249 = vector.load %arg24[%c0_105, %c0_106, %c0_107] : memref<1x8x32xf32, #tpu.memory_space<vmem>>, vector<1x8x32xf32>
    tpu.vector_store %arg24[%c0_105, %c0_106, %c0_107], %248 {strides = array<i32>} : memref<1x8x32xf32, #tpu.memory_space<vmem>>, vector<1x8x32xf32>,
    return
  }
  func.func @transform_0(%arg0: i32) -> (i32, i32, i32) {
    %c0_i32 = arith.constant 0 : i32
    %c0_i32_0 = arith.constant 0 : i32
    %c0_i32_1 = arith.constant 0 : i32
    return %arg0, %c0_i32, %c0_i32_0 : i32, i32, i32
  }
  func.func @transform_1(%arg0: i32) -> (i32, i32, i32) {
    %c0_i32 = arith.constant 0 : i32
    %c0_i32_0 = arith.constant 0 : i32
    %c0_i32_1 = arith.constant 0 : i32
    return %arg0, %c0_i32, %c0_i32_0 : i32, i32, i32
  }
  func.func @transform_2(%arg0: i32) -> (i32, i32, i32) {
    %c0_i32 = arith.constant 0 : i32
    %c0_i32_0 = arith.constant 0 : i32
    %c0_i32_1 = arith.constant 0 : i32
    return %arg0, %c0_i32, %c0_i32_0 : i32, i32, i32
  }
  func.func @transform_3(%arg0: i32) -> (i32, i32, i32) {
    %c0_i32 = arith.constant 0 : i32
    %c0_i32_0 = arith.constant 0 : i32
    %c0_i32_1 = arith.constant 0 : i32
    return %arg0, %c0_i32, %c0_i32_0 : i32, i32, i32
  }
  func.func @transform_4(%arg0: i32) -> (i32, i32, i32) {
    %c0_i32 = arith.constant 0 : i32
    %c0_i32_0 = arith.constant 0 : i32
    %c0_i32_1 = arith.constant 0 : i32
    return %arg0, %c0_i32, %c0_i32_0 : i32, i32, i32
  }
  func.func @transform_5(%arg0: i32) -> (i32, i32) {
    %c0_i32 = arith.constant 0 : i32
    %c0_i32_0 = arith.constant 0 : i32
    %c0_i32_1 = arith.constant 0 : i32
    return %c0_i32, %c0_i32_0 : i32, i32
  }
  func.func @transform_6(%arg0: i32) -> (i32, i32) {
    %c0_i32 = arith.constant 0 : i32
    %c0_i32_0 = arith.constant 0 : i32
    %c0_i32_1 = arith.constant 0 : i32
    return %c0_i32, %c0_i32_0 : i32, i32
  }
  func.func @transform_7(%arg0: i32) -> (i32, i32) {
    %c0_i32 = arith.constant 0 : i32
    %c0_i32_0 = arith.constant 0 : i32
    %c0_i32_1 = arith.constant 0 : i32
    return %c0_i32, %c0_i32_0 : i32, i32
  }
  func.func @transform_8(%arg0: i32) -> (i32, i32) {
    %c0_i32 = arith.constant 0 : i32
    %c0_i32_0 = arith.constant 0 : i32
    %c0_i32_1 = arith.constant 0 : i32
    return %c0_i32, %c0_i32_0 : i32, i32
  }
  func.func @transform_9(%arg0: i32) -> (i32, i32) {
    %c0_i32 = arith.constant 0 : i32
    %c0_i32_0 = arith.constant 0 : i32
    %c0_i32_1 = arith.constant 0 : i32
    return %c0_i32, %c0_i32_0 : i32, i32
  }
  func.func @transform_10(%arg0: i32) -> (i32, i32) {
    %c0_i32 = arith.constant 0 : i32
    %c0_i32_0 = arith.constant 0 : i32
    %c0_i32_1 = arith.constant 0 : i32
    return %c0_i32, %c0_i32_0 : i32, i32
  }
  func.func @transform_11(%arg0: i32) -> (i32, i32) {
    %c0_i32 = arith.constant 0 : i32
    %c0_i32_0 = arith.constant 0 : i32
    %c0_i32_1 = arith.constant 0 : i32
    return %c0_i32, %c0_i32_0 : i32, i32
  }
  func.func @transform_12(%arg0: i32) -> (i32, i32) {
    %c0_i32 = arith.constant 0 : i32
    %c0_i32_0 = arith.constant 0 : i32
    %c0_i32_1 = arith.constant 0 : i32
    return %c0_i32, %c0_i32_0 : i32, i32
  }
  func.func @transform_13(%arg0: i32) -> (i32, i32) {
    %c0_i32 = arith.constant 0 : i32
    %c0_i32_0 = arith.constant 0 : i32
    %c0_i32_1 = arith.constant 0 : i32
    return %c0_i32, %c0_i32_0 : i32, i32
  }
  func.func @transform_14(%arg0: i32) -> (i32, i32) {
    %c0_i32 = arith.constant 0 : i32
    %c0_i32_0 = arith.constant 0 : i32
    %c0_i32_1 = arith.constant 0 : i32
    return %c0_i32, %c0_i32_0 : i32, i32
  }
  func.func @transform_15(%arg0: i32) -> (i32, i32) {
    %c0_i32 = arith.constant 0 : i32
    %c0_i32_0 = arith.constant 0 : i32
    %c0_i32_1 = arith.constant 0 : i32
    return %c0_i32, %c0_i32_0 : i32, i32
  }
  func.func @transform_16(%arg0: i32) -> (i32, i32) {
    %c0_i32 = arith.constant 0 : i32
    %c0_i32_0 = arith.constant 0 : i32
    %c0_i32_1 = arith.constant 0 : i32
    return %c0_i32, %c0_i32_0 : i32, i32
  }
  func.func @transform_17(%arg0: i32) -> (i32, i32) {
    %c0_i32 = arith.constant 0 : i32
    %c0_i32_0 = arith.constant 0 : i32
    %c0_i32_1 = arith.constant 0 : i32
    return %c0_i32, %c0_i32_0 : i32, i32
  }
  func.func @transform_18(%arg0: i32) -> (i32, i32) {
    %c0_i32 = arith.constant 0 : i32
    %c0_i32_0 = arith.constant 0 : i32
    %c0_i32_1 = arith.constant 0 : i32
    return %c0_i32, %c0_i32_0 : i32, i32
  }
  func.func @transform_19(%arg0: i32) -> (i32, i32) {
    %c0_i32 = arith.constant 0 : i32
    %c0_i32_0 = arith.constant 0 : i32
    %c0_i32_1 = arith.constant 0 : i32
    return %c0_i32, %c0_i32_0 : i32, i32
  }
  func.func @transform_20(%arg0: i32) -> (i32, i32) {
    %c0_i32 = arith.constant 0 : i32
    %c0_i32_0 = arith.constant 0 : i32
    %c0_i32_1 = arith.constant 0 : i32
    return %c0_i32, %c0_i32_0 : i32, i32
  }
  func.func @transform_21(%arg0: i32) -> (i32, i32) {
    %c0_i32 = arith.constant 0 : i32
    %c0_i32_0 = arith.constant 0 : i32
    %c0_i32_1 = arith.constant 0 : i32
    return %c0_i32, %c0_i32_0 : i32, i32
  }
  func.func @transform_22(%arg0: i32) -> (i32, i32) {
    %c0_i32 = arith.constant 0 : i32
    %c0_i32_0 = arith.constant 0 : i32
    %c0_i32_1 = arith.constant 0 : i32
    return %c0_i32, %c0_i32_0 : i32, i32
  }
  func.func @transform_23(%arg0: i32) -> (i32, i32, i32) {
    %c0_i32 = arith.constant 0 : i32
    %c0_i32_0 = arith.constant 0 : i32
    %c0_i32_1 = arith.constant 0 : i32
    return %arg0, %c0_i32, %c0_i32_0 : i32, i32, i32
  }
}

</mosaic_0001>

<bundles_post_ra>
// kernel: decoder_block.1
= control target key start
LH: loop header
LB: loop body
LE: loop exit
PB: predicated region body
PF: predicated region fallthrough
CT: control target
= control target key end

     0   :  { %s4694_s0 = inlined_call_operand.hbm [shape: f32[2,8,32], index: 0, kind: input, shape index: {}]   ;;  %s4695_s1 = inlined_call_operand.hbm [shape: f32[2,8,32], index: 1, kind: input, shape index: {}]   ;;  %s4696_s2 = inlined_call_operand.hbm [shape: f32[2,8,32], index: 2, kind: input, shape index: {}]   ;;  %s4697_s3 = inlined_call_operand.vmem [shape: f32[2,8,8], index: 3, kind: input, shape index: {}]   ;;  %s4698_s4 = inlined_call_operand.vmem [shape: f32[2,8,8], index: 4, kind: input, shape index: {}]   ;;  %s4699_s5 = inlined_call_operand.vmem [shape: f32[32,96], index: 5, kind: input, shape index: {}]   ;;  %s4700_s6 = inlined_call_operand.vmem [shape: f32[32,32], index: 6, kind: input, shape index: {}]   ;;  %s4701_s7 = inlined_call_operand.vmem [shape: f32[1,32], index: 7, kind: input, shape index: {}]   ;;  %s4702_s8 = inlined_call_operand.vmem [shape: f32[1,32], index: 8, kind: input, shape index: {}]   ;;  %s4703_s9 = inlined_call_operand.vmem [shape: f32[1,32], index: 9, kind: input, shape index: {}]   ;;  %s4704_s10 = inlined_call_operand.vmem [shape: f32[32,32], index: 10, kind: input, shape index: {}]   ;;  %s4705_s11 = inlined_call_operand.vmem [shape: f32[32,32], index: 11, kind: input, shape index: {}]   ;;  %s4706_s12 = inlined_call_operand.vmem [shape: f32[32,32], index: 12, kind: input, shape index: {}]   ;;  %s4707_s13 = inlined_call_operand.vmem [shape: f32[32,32], index: 13, kind: input, shape index: {}]   ;;  %s4708_s14 = inlined_call_operand.vmem [shape: f32[1,32], index: 14, kind: input, shape index: {}]   ;;  %s4709_s15 = inlined_call_operand.vmem [shape: f32[1,32], index: 15, kind: input, shape index: {}]   ;;  %s4710_s16 = inlined_call_operand.vmem [shape: f32[1,32], index: 16, kind: input, shape index: {}]   ;;  %s4711_s17 = inlined_call_operand.vmem [shape: f32[32,128], index: 17, kind: input, shape index: {}]   ;;  %s4712_s18 = inlined_call_operand.hbm [shape: f32[1,128], index: 18, kind: input, shape index: {}]   ;;  %s4713_s19 = inlined_call_operand.vmem [shape: f32[128,32], index: 19, kind: input, shape index: {}]   ;;  %s4714_s20 = inlined_call_operand.hbm [shape: f32[1,32], index: 20, kind: input, shape index: {}]   ;;  %s4715_s21 = inlined_call_operand.vmem [shape: f32[1,32], index: 21, kind: input, shape index: {}]   ;;  %s4716_s22 = inlined_call_operand.vmem [shape: f32[1,32], index: 22, kind: input, shape index: {}]   ;;  %s4717_s23 = inlined_call_operand.hbm [shape: f32[2,8,32], index: 23, kind: output, shape index: {}]  }
   0x1   :  { %4750 = sst [smem:[#allocation22_spill]] %s4694_s0 }
   0x2   :  { %4751 = sst [smem:[#allocation23_spill]] %s4695_s1 }
   0x3   :  { %4752 = sst [smem:[#allocation24_spill]] %s4696_s2 }
   0x4   :  { %4753 = sst [smem:[#allocation25_spill]] %s4697_s3 }
   0x5   :  { %4754 = sst [smem:[#allocation26_spill]] %s4698_s4 }
   0x6   :  { %4755 = sst [smem:[#allocation27_spill]] %s4699_s5 }
   0x7   :  { %4756 = sst [smem:[#allocation28_spill]] %s4700_s6 }
   0x8   :  { %4757 = sst [smem:[#allocation29_spill]] %s4701_s7 }
   0x9   :  { %4758 = sst [smem:[#allocation30_spill]] %s4709_s15 }
   0xa   :  { %4759 = sst [smem:[#allocation31_spill]] %s4710_s16 }
   0xb   :  { %4760 = sst [smem:[#allocation32_spill]] %s4712_s18 }
   0xc   :  { %4761 = sst [smem:[#allocation33_spill]] %s4713_s19 }
   0xd   :  { %4762 = sst [smem:[#allocation34_spill]] %s4714_s20 }
   0xe   :  { %4763 = sst [smem:[#allocation35_spill]] %s4715_s21 }
   0xf   :  { %4764 = sst [smem:[#allocation36_spill]] %s4716_s22 }
  0x10   :  { %4765 = sst [smem:[#allocation37_spill]] %s4717_s23 }
  0x11   :  { %28 = vsyncpa [#allocation3], 0 }
  0x12   :  { %30 = vsyncpa [#allocation3 + $0x1], 0 }
  0x13   :  { %31 = vsyncpa [#allocation6], 0 }
  0x14   :  { %33 = vsyncpa [#allocation6 + $0x1], 0 }
  0x15   :  { %34 = vsyncpa [#allocation9], 0 }
  0x16   :  { %35 = vsyncpa [#allocation4], 0 }
  0x17   :  { %37 = vsyncpa [#allocation4 + $0x1], 0  ;;  %s4030_s4 = smov 0   ;;  %s4032_s30 = smov 0  }
  0x18   :  { %s4034_s24 = smov 0   ;;  %s4036_s25 = smov 0  }
  0x19 LB: > { %4766 = sst [smem:[#allocation16_spill]] %s3873_s4  ;;  %s4051_s5 = sadd.s32 4294967295, %s3885_s25   ;;  %s3885_s25 = sphi %s4036_s25, %s4823_s25   ;;  %s3881_s24 = sphi %s4034_s24, %s4827_s24   ;;  %s3877_s30 = sphi %s4032_s30, %s4826_s30   ;;  %s3873_s4 = sphi %s4030_s4, %s4825_s4  }
  0x1a   : > { %4767 = sst [smem:[#allocation17_spill]] %s3885_s25  ;;  %s3126_s1 = sadd.s32 4294967294, %s3885_s25  }
  0x1b   : > { %p63_p0 = scmp.ne.s32.totalorder %s3877_s30, %s3873_s4  ;;  %p4728_p1 = scmp.eq.s32.totalorder %s4051_s5, 0 }
  0x1c   : > { %p575_p3 = scmp.eq.s32.totalorder %s3126_s1, 1  ;;  %p3127_p5 = scmp.ge.s32.totalorder %s3885_s25, 1 }
  0x1d   : > { %p4060_p4 = por %p4728_p1, %p63_p0  ;;  %p582_p7 = scmp.lt.s32.totalorder %s3885_s25, 3 }
  0x1e   : > { %p4065_p6 = por %p575_p3, %p63_p0  ;;  %s3887_s27 = smov [#allocation8]  }
  0x1f   : > { %s4768_s26 = scalar_select %p4060_p4, 1, 0 }
  0x20   : > { %s4769_s2 = scalar_select %p4065_p6, 1, 0 }
  0x21   : > { %p4070_p8 = pnand %p3127_p5, %p582_p7  ;;  %s634_s7 = sshll.u32 %s3887_s27, 4  ;;  %s635_s7 = int_to_ptr.vmem [resolvable:$true] %s634_s7 }
  0x22   : > { %4770 = sst [smem:[#allocation18_spill]] %s4769_s2  ;;  %s4078_s28 = sadd.s32 1, %s3885_s25  }
  0x23   : > { %s4771_s6 = scalar_select %p4070_p8, 1, 0 }
  0x24   : > { %p3549_p10 = pneg %p4070_p8  ;;  %4772 = sst [smem:[#allocation19_spill]] %s4078_s28 }
  0x25   : > { %s47_s3 = ssub.s32 %s3885_s25, %s4078_s28  ;;  %s50_s1 = sadd.s32 1, %s3881_s24 }
  0x26   : > { %p4082_p11 = pnand %p3549_p10, %p4728_p1  ;;  %p4088_p12 = scmp.eq.s32.totalorder %s47_s3, 0 }
  0x27   : > { %s4775_s18 = sld [smem:[#allocation32_spill]] }
  0x28   : > { %s4773_s29 = scalar_select %p4082_p11, 1, 0 }
  0x29   : > { %s4774_s0 = scalar_select %p4088_p12, 1, 0 }
  0x2a   : > { %p4735_p3 = pneg %p4082_p11 }
  0x2d   : > { %s3665_s4 = scalar_lea.hbm %s4775_s18, 16 }
  0x2e   : > { %p3666_p0 = scmp.ne.s32.totalorder %s4775_s18, %s3665_s4  ;;  %p3672_p10 = scmp.lt.u32.totalorder %s3665_s4, %s4775_s18 }
  0x30   : > { %p3668_p5 = pnand %p4735_p3, %p3666_p0 }
  0x32   : > { %p3669_p7 = pneg %p3668_p5 }
  0x34   : > { %p3674_p9 = pnand %p3672_p10, %p3669_p7 }
  0x36   : > { %3677 = shalt.err (!%p3674_p9)
}
  0x37   : > { %s3678_s21 = scalar_lea.vmem %s635_s7, 16  ;;  %s3685_s22 = scalar_lea.vmem %s635_s7, 32 }
  0x38   : > { %p3679_p1 = scmp.ne.s32.totalorder %s635_s7, %s3678_s21  ;;  %p3686_p6 = scmp.lt.s32.totalorder %s635_s7, %s635_s7 }
  0x39   : > { %p3687_p4 = scmp.lt.s32.totalorder %s3685_s22, %s3678_s21 }
  0x3a   : > { %p3681_p2 = pnand %p3679_p1, %p4735_p3 }
  0x3b   : > { %p3688_p8 = por %p3687_p4, %p3686_p6 }
  0x3c   : > { %p3682_p13 = pneg %p3681_p2 }
  0x3e   : > { %p3689_p12 = pnand %p3688_p8, %p3682_p13 }
  0x40   : > { %3692 = shalt.err (!%p3689_p12)
}
  0x41   : > { %3552 = dma.hbm_to_vmem [thread:$0]  (!%p4082_p11), %s4775_s18, 16, %s635_s7, [#allocation9]  }
  0x42   : > { %p4776_p1 = scmp.ne.s32.totalorder %s4774_s0, 0  ;;  %p58_p2 = scmp.eq.s32.totalorder %s3885_s25, 0 }
  0x43   : > { %p4778_p4 = scmp.ne.s32.totalorder %s3881_s24, %s3877_s30  ;;  %p4779_p6 = scmp.eq.s32.totalorder %s4051_s5, 1 }
  0x44   : > { %s4120_s21 = scalar_select %p4776_p1, %s3881_s24, %s50_s1  }
  0x45   : > { %p4128_p8 = por %p4779_p6, %p4778_p4  ;;  %p3572_p9 = scmp.lt.s32.totalorder %s3885_s25, 2 }
  0x46   : > { %4777 = sst [smem:[#allocation20_spill]] %s4120_s21  ;;  %s4731_s28 = sand.u32 1, %s3881_s24  }
  0x47   : > { %s4780_s4 = scalar_select %p4128_p8, 1, 0 }
  0x48   : > { %p4782_p12 = pmov %p4778_p4  ;;  %s4139_s27 = sshll.u32 %s4731_s28, 3 }
  0x49   : > { %4781 = sst [smem:[#allocation21_spill]] %s4780_s4  ;;  %s4142_s3 = sshll.u32 %s3885_s25, 7 }
  0x4a   : > { %p59_p13 = por %p58_p2, %p4782_p12  ;;  %s683_s7 = sand.u32 1, %s3885_s25  }
  0x4b   : > { %s4784_s23 = sld [smem:[#allocation23_spill]]  ;;  %s687_s28 = scalar_lea.vmem [#allocation5], %s4139_s27 }
  0x4c   : > { %p4145_p0 = pnand %p3572_p9, %p59_p13  ;;  %s694_s18 = sshll.u32 %s687_s28, 4  ;;  %s4156_s18 = int_to_ptr.vmem [resolvable:$true] %s694_s18 }
  0x4d   : > { %s4158_s21 = scalar_lea.sflag [#allocation6], %s683_s7 }
  0x4e   : > { %s4783_s0 = scalar_select %p4145_p0, 1, 0 }
  0x4f   : > { %p4164_p7 = pneg %p4145_p0 }
  0x51   : > { %s4153_s2 = scalar_lea.hbm %s4784_s23, %s4142_s3  ;;  %s3698_s16 = scalar_lea.hbm %s4784_s23, 256 }
  0x52   : > { %s3693_s25 = scalar_lea.hbm %s4153_s2, 128  ;;  %p3699_p2 = scmp.lt.u32.totalorder %s4153_s2, %s4784_s23 }
  0x53   : > { %p3694_p5 = scmp.ne.s32.totalorder %s4153_s2, %s3693_s25  ;;  %p3700_p4 = scmp.lt.u32.totalorder %s3698_s16, %s3693_s25 }
  0x54   : > { %s4785_s4 = scalar_select %p4164_p7, 1, 0 }
  0x55   : > { %p3696_p10 = pnand %p4164_p7, %p3694_p5  ;;  %p3701_p6 = por %p3700_p4, %p3699_p2 }
  0x56   : > { %p3702_p9 = scmp.lt.u32.totalorder %s3693_s25, %s4153_s2 }
  0x57   : > { %p3697_p1 = pneg %p3696_p10 }
  0x58   : > { %p3703_p12 = por %p3702_p9, %p3701_p6 }
  0x5a   : > { %p3704_p13 = pnand %p3703_p12, %p3697_p1 }
  0x5c   : > { %3707 = shalt.err (!%p3704_p13)
}
  0x5d   : > { %s3708_s7 = scalar_lea.vmem %s4156_s18, 128  ;;  %s3888_s1 = smov [#allocation5]  }
  0x5e   : > { %p3709_p5 = scmp.ne.s32.totalorder %s4156_s18, %s3708_s7  ;;  %s3713_s22 = sshll.u32 %s3888_s1, 4  ;;  %s3714_s22 = int_to_ptr.vmem [resolvable:$false] %s3713_s22 }
  0x5f   : > { %s3715_s15 = scalar_lea.vmem %s3714_s22, 256  ;;  %p3716_p8 = scmp.lt.s32.totalorder %s4156_s18, %s3714_s22 }
  0x60   : > { %p3711_p10 = pnand %p3709_p5, %p4164_p7  ;;  %p3717_p11 = scmp.lt.s32.totalorder %s3715_s15, %s3708_s7 }
  0x62   : > { %p3712_p3 = pneg %p3711_p10  ;;  %p3718_p2 = por %p3717_p11, %p3716_p8 }
  0x64   : > { %p3719_p4 = pnand %p3718_p2, %p3712_p3 }
  0x66   : > { %3722 = shalt.err (!%p3719_p4)
}
  0x67   : > { %3562 = dma.hbm_to_vmem [thread:$0]  (!%p4145_p0), %s4153_s2, 128, %s4156_s18, %s4158_s21  }
  0x68   : > { %s3889_s16 = smov [#allocation10]   ;;  %s4786_s20 = sld [smem:[#allocation34_spill]] }
  0x69   : > { %s648_s25 = sshll.u32 %s3889_s16, 4  ;;  %p4787_p3 = scmp.ne.s32.totalorder %s4773_s29, 0  ;;  %s649_s25 = int_to_ptr.vmem [resolvable:$true] %s648_s25 }
  0x6b   : > { %p4788_p8 = pneg %p4787_p3 }
  0x6e   : > { %s3723_s1 = scalar_lea.hbm %s4786_s20, 16 }
  0x6f   : > { %p3724_p11 = scmp.ne.s32.totalorder %s4786_s20, %s3723_s1  ;;  %p3730_p9 = scmp.lt.u32.totalorder %s3723_s1, %s4786_s20 }
  0x71   : > { %p3726_p1 = pnand %p3724_p11, %p4788_p8 }
  0x73   : > { %p3727_p6 = pneg %p3726_p1 }
  0x75   : > { %p3732_p12 = pnand %p3730_p9, %p3727_p6 }
  0x77   : > { %3735 = shalt.err (!%p3732_p12)
}
  0x78   : > { %s3736_s18 = scalar_lea.vmem %s649_s25, 16  ;;  %p4789_p5 = pmov %p4788_p8 }
  0x79   : > { %p3737_p13 = scmp.ne.s32.totalorder %s649_s25, %s3736_s18  ;;  %s3743_s23 = scalar_lea.vmem %s649_s25, 32 }
  0x7a   : > { %p3744_p4 = scmp.lt.s32.totalorder %s649_s25, %s649_s25  ;;  %p3745_p0 = scmp.lt.s32.totalorder %s3743_s23, %s3736_s18 }
  0x7b   : > { %p3739_p10 = pnand %p3737_p13, %p4789_p5 }
  0x7c   : > { %p3746_p7 = por %p3745_p0, %p3744_p4 }
  0x7d   : > { %p3740_p2 = pneg %p3739_p10 }
  0x7f   : > { %p3747_p8 = pnand %p3746_p7, %p3740_p2 }
  0x81   : > { %3750 = shalt.err (!%p3747_p8)
}
  0x82   : > { %3555 = dma.hbm_to_vmem [thread:$0]  (!%p4787_p3), %s4786_s20, 16, %s649_s25, [#allocation9]  }
  0x83   : > { %s4790_s1 = sld [smem:[#allocation22_spill]]  ;;  %s669_s7 = scalar_lea.vmem [#allocation2], %s4139_s27 }
  0x84   : > { %s676_s15 = sshll.u32 %s669_s7, 4  ;;  %s4791_s29 = sand.u32 1, %s3881_s24   ;;  %s677_s15 = int_to_ptr.vmem [resolvable:$true] %s676_s15 }
  0x85   : > { %s666_s18 = scalar_lea.sflag [#allocation3], %s4791_s29  ;;  %p4792_p7 = scmp.ne.s32.totalorder %s4785_s4, 0 }
  0x89   : > { %s4212_s22 = scalar_lea.hbm %s4790_s1, %s4142_s3  ;;  %s3756_s2 = scalar_lea.hbm %s4790_s1, 256 }
  0x8a   : > { %s3751_s23 = scalar_lea.hbm %s4212_s22, 128  ;;  %p3757_p3 = scmp.lt.u32.totalorder %s4212_s22, %s4790_s1 }
  0x8b   : > { %p3752_p0 = scmp.ne.s32.totalorder %s4212_s22, %s3751_s23  ;;  %p3758_p6 = scmp.lt.u32.totalorder %s3756_s2, %s3751_s23 }
  0x8c   : > { %p3760_p12 = scmp.lt.u32.totalorder %s3751_s23, %s4212_s22 }
  0x8d   : > { %p3754_p11 = pnand %p3752_p0, %p4792_p7  ;;  %p3759_p9 = por %p3758_p6, %p3757_p3 }
  0x8f   : > { %p3755_p1 = pneg %p3754_p11  ;;  %p3761_p13 = por %p3760_p12, %p3759_p9 }
  0x91   : > { %p3762_p5 = pnand %p3761_p13, %p3755_p1 }
  0x93   : > { %3765 = shalt.err (!%p3762_p5)
}
  0x94   : > { %s3766_s7 = scalar_lea.vmem %s677_s15, 128  ;;  %s3890_s29 = smov [#allocation2]  }
  0x95   : > { %p3767_p10 = scmp.ne.s32.totalorder %s677_s15, %s3766_s7  ;;  %s3771_s20 = sshll.u32 %s3890_s29, 4  ;;  %s3772_s20 = int_to_ptr.vmem [resolvable:$false] %s3771_s20 }
  0x96   : > { %s3773_s25 = scalar_lea.vmem %s3772_s20, 256  ;;  %p3774_p8 = scmp.lt.s32.totalorder %s677_s15, %s3772_s20 }
  0x97   : > { %p3769_p2 = pnand %p3767_p10, %p4792_p7  ;;  %p3775_p0 = scmp.lt.s32.totalorder %s3773_s25, %s3766_s7 }
  0x99   : > { %p3770_p4 = pneg %p3769_p2  ;;  %p3776_p11 = por %p3775_p0, %p3774_p8 }
  0x9b   : > { %p3777_p3 = pnand %p3776_p11, %p3770_p4 }
  0x9d   : > { %3780 = shalt.err (!%p3777_p3)
}
  0x9e   : > { %p4793_p6 = scmp.ne.s32.totalorder %s4783_s0, 0  ;;  %s4794_s2 = sld [smem:[#allocation24_spill]] }
  0x9f   : > { %s705_s20 = scalar_lea.vmem [#allocation7], %s4139_s27 }
  0xa0   : > { %3559 = dma.hbm_to_vmem [thread:$0]  (!%p4793_p6), %s4212_s22, 128, %s677_s15, %s666_s18  }
  0xa1   : > { %s712_s28 = sshll.u32 %s705_s20, 4  ;;  %s713_s28 = int_to_ptr.vmem [resolvable:$true] %s712_s28 }
  0xa4   : > { %s4238_s16 = scalar_lea.hbm %s4794_s2, %s4142_s3  ;;  %s3786_s22 = scalar_lea.hbm %s4794_s2, 256 }
  0xa5   : > { %s3781_s7 = scalar_lea.hbm %s4238_s16, 128  ;;  %p3787_p13 = scmp.lt.u32.totalorder %s4238_s16, %s4794_s2 }
  0xa6   : > { %p3782_p1 = scmp.ne.s32.totalorder %s4238_s16, %s3781_s7  ;;  %p3788_p5 = scmp.lt.u32.totalorder %s3786_s22, %s3781_s7 }
  0xa7   : > { %p3790_p2 = scmp.lt.u32.totalorder %s3781_s7, %s4238_s16 }
  0xa8   : > { %p3784_p9 = pnand %p3782_p1, %p4792_p7  ;;  %p3789_p10 = por %p3788_p5, %p3787_p13 }
  0xaa   : > { %p3785_p12 = pneg %p3784_p9  ;;  %p3791_p4 = por %p3790_p2, %p3789_p10 }
  0xac   : > { %p3792_p8 = pnand %p3791_p4, %p3785_p12 }
  0xae   : > { %3795 = shalt.err (!%p3792_p8)
}
  0xaf   : > { %s3796_s27 = scalar_lea.vmem %s713_s28, 128  ;;  %s3891_s3 = smov [#allocation7]  }
  0xb0   : > { %p3797_p0 = scmp.ne.s32.totalorder %s713_s28, %s3796_s27  ;;  %s3801_s23 = sshll.u32 %s3891_s3, 4  ;;  %s3802_s23 = int_to_ptr.vmem [resolvable:$false] %s3801_s23 }
  0xb1   : > { %s3803_s19 = scalar_lea.vmem %s3802_s23, 256  ;;  %p3804_p1 = scmp.lt.s32.totalorder %s713_s28, %s3802_s23 }
  0xb2   : > { %p3799_p11 = pnand %p3797_p0, %p4792_p7  ;;  %p3805_p9 = scmp.lt.s32.totalorder %s3803_s19, %s3796_s27 }
  0xb4   : > { %p3800_p3 = pneg %p3799_p11  ;;  %p3806_p6 = por %p3805_p9, %p3804_p1 }
  0xb6   : > { %p3807_p5 = pnand %p3806_p6, %p3800_p3 }
  0xb8   : > { %3810 = shalt.err (!%p3807_p5)
}
  0xb9   : > { %p4795_p13 = scmp.ne.s32.totalorder %s4783_s0, 0  ;;  %p4796_p12 = scmp.ne.s32.totalorder %s4771_s6, 0 }
  0xba   : > { %s4262_s4 = sand.u32 (!%p4796_p12), 1, %s3877_s30   ;;  %p4797_p7 = scmp.ne.s32.totalorder (!%p4796_p12), %s4768_s26, 0 }
  0xbb   : > { %3565 = dma.hbm_to_vmem [thread:$0]  (!%p4795_p13), %s4238_s16, 128, %s713_s28, %s4158_s21  }
  0xbc   : > { %735 = sbr.rel (%p4796_p12) target bundleno = 4470 (0x1176), region = 112  ;;  %s4265_s20 = sshll.u32 (!%p4796_p12), %s4262_s4, 3 }
  0xbd   : > { %s738_s7 = scalar_lea.sflag (!%p4796_p12), [#allocation3], %s4262_s4  ;;  %s741_s29 = scalar_lea.vmem (!%p4796_p12), [#allocation2], %s4265_s20 }
  0xc3   : > { %3856 = dma.done.wait (%p4797_p7), %s738_s7, 128  }
  0xc4   : > { %3858 = vsyncadd (%p4797_p7), %s738_s7, 4294967168  ;;  %s746_s6 = sand.u32 1, %s4051_s5   ;;  %s750_s0 = scalar_lea.vmem [#allocation5], %s4265_s20 }
  0xc5   : > { %s747_s21 = scalar_lea.sflag [#allocation6], %s746_s6 }
  0xc6   : > { %3860 = dma.done.wait (%p4797_p7), %s747_s21, 256  }
  0xc7   : > { %3862 = vsyncadd (%p4797_p7), %s747_s21, 4294967040  ;;  %s759_s16 = scalar_lea.vmem [#allocation7], %s4265_s20  ;;  %p4798_p6 = scmp.eq.s32.totalorder %s4051_s5, 0 }
  0xc9   : > { %3864 = dma.done.wait (%p4798_p6), [#allocation9], 32   ;;  %p4799_p10 = pmov %p4798_p6 }
  0xca   : > { %v3892_v0 = vmov 0.0|0.0   ;;  %vm3893_vm0 = vmmov 0   ;;  %v3894_v1 = vmov 0.0   ;;  %s4800_s25 = sld [smem:[#allocation27_spill]]  ;;  %v4303_v8 = vld [vmem:[%s741_s29] sm:$0xff]  ;;  %vm863_vm1 = vcmask 261120  }
  0xcb   : > { %3866 = vsyncadd (%p4799_p10), [#allocation9], 4294967264  ;;  %3467 = vmatprep.subr.bf16.mxu1 %v3892_v0  ;;  %3283 = vmatprep.mubr.msk.f32.mxu1 %vm3893_vm0, %v3894_v1  ;;  %s3895_s7 = smov 120   ;;  %s3896_s6 = smov 96   ;;  %vm946_vm2 = vcmask 64512   ;;  %vm1616_vm3 = vcmask 130048  }
  0xcc   : > { %3296 = vmatprep.subr.mxu0 %v3894_v1  ;;  %3298 = vmatprep.mubr.msk.f32.mxu0 %vm3893_vm0, %v3894_v1  ;;  %s3897_s29 = smov 80   ;;  %s3898_s21 = smov 88   ;;  %vm1618_vm4 = vcmask 195584  }
  0xcd   : > { %s3899_s26 = smov 72   ;;  %s3900_s28 = smov 112  }
  0xce   : > { %p848_p2 = scmp.lt.s32.totalorder %s4051_s5, 1  ;;  %s4802_s23 = sld [smem:[#allocation25_spill]] }
  0xcf   : > { %s4804_s27 = sld [smem:[#allocation29_spill]]  ;;  %s4807_s3 = smov 8  }
  0xd0   : > { %s4801_s22 = smov %s4800_s25  ;;  %v859_v2 = vld [vmem:[%s4800_s25] sm:$0xff]  ;;  %s3901_s25 = smov 104  }
  0xd1   : > { %v860_v3 = vld [vmem:[%s4801_s22 + $0x8] sm:$0xff]  ;;  %v861_v4 = vld [vmem:[%s4801_s22 + $0x10] sm:$0xff]  ;;  %v862_v6 = vld [vmem:[%s4801_s22 + $0x18] sm:$0xff]  ;;  %s4345_s15 = scalar_select %p848_p2, %s4051_s5, 1 }
  0xd2   : > { %v3468_v5 = vpack.c.bf16 %v860_v3, %v859_v2  ;;  %v3471_v7 = vpack.c.bf16 %v862_v6, %v861_v4 }
  0xd3   : > { %s4748_s18 = sshll.u32 %s4345_s15, 3 }
  0xd4   : > { %3469 = vmatpush3.bf16.msra.mxu1 %v3468_v5  ;;  %s851_s19 = scalar_lea.vmem %s4802_s23, %s4748_s18  ;;  %s4803_s23 = sld [smem:[#allocation28_spill]] }
  0xd5   : > { %3470 = vmatprep.subr.bf16.mxu1 %v3892_v0  ;;  %v942_v18 = vld [vmem:[%s851_s19] sm:$0xff]  ;;  %s4746_s19 = smov 16   ;;  %s4806_s18 = sld [smem:[#allocation26_spill]] }
  0xd8   : > { %3472 = vmatpush3.bf16.msra.mxu1 %v3471_v7 }
  0xd9   : > { %3286 = vmatprep.subr.mxu1 %v3894_v1 }
  0xdb   : > { %3284 = vmatmul.mubr.msk.f32.vlgmr.msra.gmra.mrb[0].mxu1 %vm863_vm1, %v4303_v8 }
  0xdc   : > { %3288 = vmatprep.mubr.msk.f32.mxu1 %vm3893_vm0, %v3894_v1 }
 0x1ae   : > { %v4310_v9 = vpop.f32.mrb[0].mxu1 }
 0x1af   : > { %1108 = vrot.lane.b32.xlu1 %v4310_v9, %s3895_s7  ;;  %944 = vrot.lane.b32.xlu0 %v4310_v9, %s3896_s6  ;;  %v3285_v10 = vpop.f32.mrb[1].mxu1  ;;  %s3902_s6 = smov 56  }
 0x1b0   : > { %v937_v10 = vld [vmem:[%s4803_s23] sm:$0xff] }
 0x1b3   : > { %1275 = vrot.lane.b32.xlu1 %v4310_v9, %s3897_s29  ;;  %1110 = vrot.lane.b32.xlu0 %v4310_v9, %s3898_s21  ;;  %s3903_s29 = smov 64   ;;  %s3904_s21 = smov 48  }
 0x1b7   : > { %1440 = vrot.lane.b32.xlu1 %v4310_v9, %s3899_s26  ;;  %1273 = vrot.lane.b32.xlu0 %v4310_v9, %s3900_s28  ;;  %s3905_s26 = smov 40  }
 0x1bb   : > { %1438 = vrot.lane.b32.xlu0 %v4310_v9, %s3901_s25 }
 0x221   : > { %v1109_v11 = vpop.permute.xlu1 %1108  ;;  %v945_v12 = vpop.permute.xlu0 %944 }
 0x222   : > { %3287 = vmatpush3.xpose.msk.msra.mxu1 %vm946_vm2, %v945_v12 }
 0x223   : > { %3291 = vmatprep.subr.mxu1 %v3894_v1 }
 0x225   : > { %3289 = vmatmul.mubr.msk.f32.vlgmr.msra.gmra.mrb[2].mxu1 %vm946_vm2, %v4310_v9  ;;  %v1111_v13 = vpop.permute.xlu0 %1110  ;;  %v1276_v14 = vpop.permute.xlu1 %1275 }
 0x226   : > { %3297 = vmatpush3.xpose.msk.msra.mxu0 %vm946_vm2, %v1111_v13  ;;  %3293 = vmatprep.mubr.msk.f32.mxu1 %vm3893_vm0, %v3894_v1 }
 0x227   : > { %3306 = vmatprep.subr.mxu0 %v3894_v1 }
 0x229   : > { %3299 = vmatmul.mubr.msk.f32.vlgmr.msra.gmra.mrb[0].mxu0 %vm946_vm2, %v1109_v11  ;;  %v1274_v15 = vpop.permute.xlu0 %1273  ;;  %v1441_v16 = vpop.permute.xlu1 %1440  ;;  %v938_v11 = vld [vmem:[%s4803_s23 + $0x8] sm:$0xff] }
 0x22a   : > { %3307 = vmatpush3.xpose.msk.msra.mxu0 %vm946_vm2, %v1276_v14  ;;  %3308 = vmatprep.mubr.msk.f32.mxu0 %vm3893_vm0, %v3894_v1  ;;  %v3474_v12 = vpack.c.bf16 %v938_v11, %v937_v10 }
 0x22b   : > { %3316 = vmatprep.subr.mxu0 %v3894_v1 }
 0x22d   : > { %3309 = vmatmul.mubr.msk.f32.vlgmr.msra.gmra.mrb[2].mxu0 %vm946_vm2, %v1274_v15  ;;  %v1439_v17 = vpop.permute.xlu0 %1438 }
 0x22e   : > { %3317 = vmatpush3.xpose.msk.msra.mxu0 %vm946_vm2, %v1441_v16  ;;  %3318 = vmatprep.mubr.msk.f32.mxu0 %vm3893_vm0, %v3894_v1 }
 0x22f   : > { %3485 = vmatprep.subr.bf16.mxu0 %v3892_v0 }
 0x231   : > { %3319 = vmatmul.mubr.msk.f32.vlgmr.msra.gmra.mrb[4].mxu0 %vm946_vm2, %v1439_v17  ;;  %v939_v17 = vld [vmem:[%s4803_s23 + $0x10] sm:$0xff] }
 0x232   : > { %3356 = vmatprep.mubr.msk.f32.mxu0 %vm3893_vm0, %v3894_v1 }
 0x2f8   : > { %v1017_v19 = vpop.f32.mrb[2].mxu1 }
 0x2f9   : > { %v1018_v20 = vadd.f32 %v1017_v19, %v942_v18  ;;  %v3290_v21 = vpop.f32.mrb[3].mxu1 }
 0x2fb   : > { %v1021_v22 = vsel %vm946_vm2, %v1018_v20, -inf }
 0x2fc   : > { %v1182_v23 = vpop.f32.mrb[0].mxu0  ;;  %1022 = vmax.xlane.f32.xlu1 %v1021_v22 }
 0x2fd   : > { %v1183_v24 = vadd.f32 %v1182_v23, %v942_v18  ;;  %v3300_v25 = vpop.f32.mrb[1].mxu0 }
 0x2ff   : > { %v1186_v26 = vsel %vm946_vm2, %v1183_v24, -inf }
 0x300   : > { %1187 = vmax.xlane.f32.xlu0 %v1186_v26  ;;  %v1347_v27 = vpop.f32.mrb[2].mxu0 }
 0x301   : > { %v1348_v28 = vadd.f32 %v1347_v27, %v942_v18  ;;  %v3310_v29 = vpop.f32.mrb[3].mxu0 }
 0x303   : > { %v1351_v30 = vsel %vm946_vm2, %v1348_v28, -inf }
 0x304   : > { %1352 = vmax.xlane.f32.xlu0 %v1351_v30  ;;  %v1512_v31 = vpop.f32.mrb[4].mxu0  ;;  %v3159_v30 = vld [vmem:[%s4804_s27] ss:$0 sm:$0xff]  ;;  %s4813_s27 = sld [smem:[#allocation21_spill]] }
 0x305   : > { %v1513_v32 = vadd.f32 %v1512_v31, %v942_v18  ;;  %v3320_v33 = vpop.f32.mrb[5].mxu0  ;;  %v940_v18 = vld [vmem:[%s4803_s23 + $0x18] sm:$0xff] }
 0x306   : > { %v3477_v19 = vpack.c.bf16 %v940_v18, %v939_v17 }
 0x307   : > { %v1516_v34 = vsel %vm946_vm2, %v1513_v32, -inf }
 0x308   : > { %1517 = vmax.xlane.f32.xlu1 %v1516_v34 }
 0x30a   : > { %p4817_p8 = scmp.ne.s32.totalorder %s4813_s27, 0 }
 0x319   : > { %1197 = vrot.lane.b32.xlu1 %v4310_v9, %s3902_s6  ;;  %s4745_s6 = smov 24  }
 0x389   : > { %v1023_v35 = vpop.xlane.xlu1 %1022 }
 0x38a   : > { %v1024_v36 = vsub.f32 %v1018_v20, %v1023_v35 }
 0x38c   : > { %v1025_v37 = vmul.f32 1.442695, %v1024_v36 }
 0x38d   : > { %v1188_v38 = vpop.xlane.xlu0 %1187 }
 0x38e   : > { %3627 = vpow2.f32 %v1025_v37  ;;  %v1189_v39 = vsub.f32 %v1183_v24, %v1188_v38 }
 0x390   : > { %v1190_v40 = vmul.f32 1.442695, %v1189_v39 }
 0x391   : > { %v1353_v50 = vpop.xlane.xlu0 %1352 }
 0x392   : > { %3629 = vpow2.f32 %v1190_v40  ;;  %v1354_v51 = vsub.f32 %v1348_v28, %v1353_v50  ;;  %v1732_v50 = vld [vmem:[%s4704_s10 + $0x10] sm:$0xff] }
 0x394   : > { %v1355_v52 = vmul.f32 1.442695, %v1354_v51  ;;  %v1733_v51 = vld [vmem:[%s4704_s10 + $0x18] sm:$0xff] }
 0x395   : > { %v1518_v41 = vpop.xlane.xlu1 %1517 }
 0x396   : > { %v1519_v42 = vsub.f32 %v1513_v32, %v1518_v41  ;;  %v1807_v41 = vld [vmem:[%s4705_s11] sm:$0xff] }
 0x398   : > { %v3628_v43 = vpop.eup %3627  ;;  %v1520_v44 = vmul.f32 1.442695, %v1519_v42  ;;  %v1808_v42 = vld [vmem:[%s4705_s11 + $0x8] sm:$0xff] }
 0x399   : > { %v1027_v45 = vsel %vm946_vm2, %v3628_v43, 0.0  ;;  %v1198_v55 = vpop.permute.xlu1 %1197 }
 0x39a   : > { %3631 = vpow2.f32 %v1520_v44  ;;  %1028 = vadd.xlane.f32.xlu0 %v1027_v45  ;;  %v1810_v44 = vld [vmem:[%s4705_s11 + $0x18] sm:$0xff] }
 0x39b   : > { %3633 = vpow2.f32 %v1355_v52  ;;  %v3483_v52 = vpack.c.bf16 %v1733_v51, %v1732_v50 }
 0x39c   : > { %v3630_v46 = vpop.eup %3629 }
 0x39d   : > { %v1192_v47 = vsel %vm946_vm2, %v3630_v46, 0.0 }
 0x39e   : > { %1193 = vadd.xlane.f32.xlu1 %v1192_v47  ;;  %v1730_v47 = vld [vmem:[%s4704_s10] sm:$0xff] }
 0x3a4   : > { %v3632_v48 = vpop.eup %3631 }
 0x3a5   : > { %v1522_v49 = vsel %vm946_vm2, %v3632_v48, 0.0  ;;  %v3634_v53 = vpop.eup %3633 }
 0x3a6   : > { %1523 = vadd.xlane.f32.xlu1 %v1522_v49  ;;  %v1357_v54 = vsel %vm946_vm2, %v3634_v53, 0.0 }
 0x3b0   : > { %1032 = vrot.lane.b32.xlu0 %v4310_v9, %s3903_s29  ;;  %s4747_s29 = smov 8  }
 0x3b7   : > { %1362 = vrot.lane.b32.xlu1 %v4310_v9, %s3904_s21  ;;  %s4809_s21 = smov 24  }
 0x3cf   : > { %1358 = vadd.xlane.f32.xlu0 %v1357_v54 }
 0x3e5   : > { %1527 = vrot.lane.b32.xlu0 %v4310_v9, %s3905_s26 }
 0x427   : > { %v1029_v56 = vpop.xlane.xlu0 %1028 }
 0x428   : > { %3635 = vrcp.f32 %v1029_v56 }
 0x42b   : > { %v1033_v57 = vpop.permute.xlu0 %1032  ;;  %v1194_v58 = vpop.xlane.xlu1 %1193 }
 0x42c   : > { %3637 = vrcp.f32 %v1194_v58  ;;  %3292 = vmatpush3.msra.mxu1 %v1033_v57  ;;  %v3161_v57 = vld [vmem:[%s4702_s8] ss:$0 sm:$0xff] }
 0x42d   : > { %3301 = vmatprep.subr.mxu1 %v3894_v1 }
 0x432   : > { %v3636_v59 = vpop.eup %3635 }
 0x433   : > { %v1031_v60 = vmul.f32 %v3636_v59, %v3628_v43  ;;  %v1524_v61 = vpop.xlane.xlu1 %1523  ;;  %v1809_v43 = vld [vmem:[%s4705_s11 + $0x10] sm:$0xff]  ;;  %v3162_v59 = vld [vmem:[%s4703_s9] ss:$0 sm:$0xff] }
 0x434   : > { %v3489_v45 = vpack.c.bf16 %v1810_v44, %v1809_v43 }
 0x435   : > { %3294 = vmatmul.mubr.msk.f32.vlgmr.msra.gmra.mrb[4].mxu1 %vm946_vm2, %v1031_v60 }
 0x436   : > { %v3638_v62 = vpop.eup %3637  ;;  %3302 = vmatpush3.msra.mxu1 %v1198_v55  ;;  %3303 = vmatprep.mubr.msk.f32.mxu1 %vm3893_vm0, %v3894_v1 }
 0x437   : > { %v1196_v63 = vmul.f32 %v3638_v62, %v3630_v46  ;;  %v1363_v2 = vpop.permute.xlu1 %1362  ;;  %3311 = vmatprep.subr.mxu1 %v3894_v1  ;;  %v858_v46 = vld [vmem:[%s759_s16] sm:$0xff] }
 0x439   : > { %3304 = vmatmul.mubr.msk.f32.vlgmr.msra.gmra.mrb[6].mxu1 %vm946_vm2, %v1196_v63 }
 0x43a   : > { %3312 = vmatpush3.msra.mxu1 %v1363_v2  ;;  %3313 = vmatprep.mubr.msk.f32.mxu1 %vm3893_vm0, %v3894_v1  ;;  %v1884_v2 = vld [vmem:[%s4706_s12] sm:$0xff] }
 0x43b   : > { %3321 = vmatprep.subr.mxu1 %v3894_v1 }
 0x45c   : > { %v1359_v3 = vpop.xlane.xlu0 %1358 }
 0x45d   : > { %3639 = vrcp.f32 %v1359_v3  ;;  %v1885_v3 = vld [vmem:[%s4706_s12 + $0x8] sm:$0xff] }
 0x45e   : > { %3641 = vrcp.f32 %v1524_v61 }
 0x460   : > { %v1528_v7 = vpop.permute.xlu0 %1527 }
 0x467   : > { %v3640_v4 = vpop.eup %3639 }
 0x468   : > { %v1361_v5 = vmul.f32 %v3640_v4, %v3634_v53  ;;  %v3642_v6 = vpop.eup %3641  ;;  %v1886_v4 = vld [vmem:[%s4706_s12 + $0x10] sm:$0xff] }
 0x469   : > { %v1526_v9 = vmul.f32 %v3642_v6, %v3632_v48  ;;  %v1731_v48 = vld [vmem:[%s4704_s10 + $0x8] sm:$0xff]  ;;  %v1887_v6 = vld [vmem:[%s4706_s12 + $0x18] sm:$0xff] }
 0x46a   : > { %3314 = vmatmul.mubr.msk.f32.vlgmr.msra.gmra.mrb[8].mxu1 %vm946_vm2, %v1361_v5  ;;  %v3480_v49 = vpack.c.bf16 %v1731_v48, %v1730_v47  ;;  %v3492_v5 = vpack.c.bf16 %v1885_v3, %v1884_v2 }
 0x46b   : > { %3322 = vmatpush3.msra.mxu1 %v1528_v7  ;;  %3323 = vmatprep.mubr.msk.f32.mxu1 %vm3893_vm0, %v3894_v1  ;;  %v3495_v7 = vpack.c.bf16 %v1887_v6, %v1886_v4 }
 0x46c   : > { %3473 = vmatprep.subr.bf16.mxu1 %v3892_v0 }
 0x46e   : > { %3324 = vmatmul.mubr.msk.f32.vlgmr.msra.gmra.mrb[10].mxu1 %vm946_vm2, %v1526_v9 }
 0x46f   : > { %3334 = vmatprep.mubr.msk.f32.mxu1 %vm3893_vm0, %v3894_v1  ;;  %3475 = vmatpush3.bf16.msra.mxu1 %v3474_v12  ;;  %v857_v12 = vld [vmem:[%s750_s0] sm:$0xff]  ;;  %s4805_s0 = sshll.u32 %s4345_s15, 3 }
 0x470   : > { %3476 = vmatprep.subr.bf16.mxu1 %v3892_v0 }
 0x473   : > { %3478 = vmatpush3.bf16.msra.mxu1 %v3477_v19 }
 0x474   : > { %3479 = vmatprep.subr.bf16.mxu1 %v3892_v0 }
 0x508   : > { %v1104_v13 = vpop.f32.mrb[4].mxu1 }
 0x509   : > { %v3295_v14 = vpop.f32.mrb[5].mxu1 }
 0x50c   : > { %v1269_v15 = vpop.f32.mrb[6].mxu1 }
 0x50d   : > { %1604 = vrot.lane.b32.xlu1 %v1269_v15, %s4747_s29  ;;  %v3305_v16 = vpop.f32.mrb[7].mxu1  ;;  %s855_s29 = scalar_lea.vmem %s4806_s18, %s4805_s0  ;;  %s4808_s0 = smov 16  }
 0x50e   : > { %v1966_v18 = vld [vmem:[%s855_s29] sm:$0xff]  ;;  %s4811_s18 = sld [smem:[#allocation30_spill]]  ;;  %s4815_s29 = sld [smem:[#allocation36_spill]] }
 0x53d   : > { %v1434_v20 = vpop.f32.mrb[8].mxu1 }
 0x53e   : > { %1608 = vrot.lane.b32.xlu0 %v1434_v20, %s4746_s19  ;;  %v3315_v21 = vpop.f32.mrb[9].mxu1  ;;  %s4816_s19 = sld [smem:[#allocation37_spill]] }
 0x541   : > { %v1599_v22 = vpop.f32.mrb[10].mxu1 }
 0x542   : > { %1612 = vrot.lane.b32.xlu1 %v1599_v22, %s4745_s6  ;;  %v3325_v23 = vpop.f32.mrb[11].mxu1  ;;  %s2957_s6 = scalar_lea.sflag [#allocation4], %s4262_s4 }
 0x57f   : > { %v1605_v24 = vpop.permute.xlu1 %1604 }
 0x580   : > { %v1615_v26 = vsel %vm946_vm2, %v1104_v13, %v1605_v24 }
 0x5b0   : > { %v1609_v25 = vpop.permute.xlu0 %1608 }
 0x5b1   : > { %v1617_v27 = vsel %vm1616_vm3, %v1615_v26, %v1609_v25 }
 0x5b4   : > { %v1613_v28 = vpop.permute.xlu1 %1612 }
 0x5b5   : > { %v1619_v29 = vsel %vm1618_vm4, %v1617_v27, %v1613_v28 }
 0x5b6   : > { %3335 = vmatmul.mubr.msk.f32.vlgmr.msra.gmra.mrb[12].mxu1 %vm863_vm1, %v1619_v29 }
 0x5b7   : > { %3345 = vmatprep.mubr.msk.f32.mxu1 %vm3893_vm0, %v3894_v1  ;;  %3481 = vmatpush3.bf16.msra.mxu1 %v3480_v49 }
 0x5b8   : > { %3482 = vmatprep.subr.bf16.mxu1 %v3892_v0 }
 0x5bb   : > { %3484 = vmatpush3.bf16.msra.mxu1 %v3483_v52 }
 0x5bc   : > { %3491 = vmatprep.subr.bf16.mxu1 %v3892_v0 }
 0x689   : > { %v1695_v31 = vpop.f32.mrb[12].mxu1 }
 0x68a   : > { %v1696_v32 = vadd.f32 %v3159_v30, %v1695_v31  ;;  %v3336_v33 = vpop.f32.mrb[13].mxu1 }
 0x68c   : > { %v1699_v34 = vadd.f32 %v1696_v32, %v4303_v8  ;;  %v3486_v8 = vpack.c.bf16 %v1808_v42, %v1807_v41 }
 0x68e   : > { %v1702_v35 = vsel %vm863_vm1, %v1699_v34, 0.0  ;;  %3487 = vmatpush3.bf16.msra.mxu0 %v3486_v8 }
 0x68f   : > { %1703 = vadd.xlane.f32.xlu0 %v1702_v35  ;;  %3488 = vmatprep.subr.bf16.mxu0 %v3892_v0 }
 0x692   : > { %3490 = vmatpush3.bf16.msra.mxu0 %v3489_v45 }
 0x693   : > { %3370 = vmatprep.subr.mxu0 %v3894_v1 }
 0x695   : > { %3357 = vmatmul.mubr.msk.f32.vlgmr.msra.gmra.mrb[6].mxu0 %vm863_vm1, %v858_v46 }
 0x696   : > { %3372 = vmatprep.mubr.msk.f32.mxu0 %vm3893_vm0, %v3894_v1 }
 0x71c   : > { %v1704_v36 = vpop.xlane.xlu0 %1703 }
 0x71d   : > { %v1706_v37 = vmul.f32 0.03125, %v1704_v36 }
 0x71f   : > { %v1707_v38 = vsub.f32 %v1699_v34, %v1706_v37 }
 0x721   : > { %v1708_v39 = vmul.f32 %v1707_v38, %v1707_v38 }
 0x723   : > { %v1709_v40 = vsel %vm863_vm1, %v1708_v39, 0.0 }
 0x724   : > { %1710 = vadd.xlane.f32.xlu1 %v1709_v40 }
 0x768   : > { %v1880_v62 = vpop.f32.mrb[6].mxu0 }
 0x769   : > { %2129 = vrot.lane.b32.xlu0 %v1880_v62, %s3895_s7  ;;  %v3358_v63 = vpop.f32.mrb[7].mxu0  ;;  %3371 = vmatpush3.xpose.msk.msra.mxu0 %vm946_vm2, %v1880_v62 }
 0x76a   : > { %3380 = vmatprep.subr.mxu0 %v3894_v1 }
 0x76d   : > { %2295 = vrot.lane.b32.xlu0 %v1880_v62, %s3900_s28 }
 0x771   : > { %2460 = vrot.lane.b32.xlu0 %v1880_v62, %s3901_s25 }
 0x7b1   : > { %v1711_v53 = vpop.xlane.xlu1 %1710 }
 0x7b2   : > { %v1712_v54 = vmul.f32 0.03125, %v1711_v53 }
 0x7b4   : > { %v1713_v55 = vadd.f32 1e-05, %v1712_v54 }
 0x7b6   : > { %3643 = vrsqrt.f32 %v1713_v55 }
 0x7c0   : > { %v3644_v56 = vpop.eup %3643 }
 0x7c1   : > { %v1715_v58 = vmul.f32 %v3644_v56, %v1707_v38 }
 0x7c3   : > { %v1722_v60 = vmul.f32 %v3161_v57, %v1715_v58 }
 0x7c5   : > { %v4449_v61 = vadd.f32 %v3162_v59, %v1722_v60 }
 0x7c7   : > { %3346 = vmatmul.mubr.msk.f32.vlgmr.msra.gmra.mrb[14].mxu1 %vm863_vm1, %v4449_v61 }
 0x7c8   : > { %3367 = vmatprep.mubr.msk.f32.mxu1 %vm3893_vm0, %v3894_v1  ;;  %3493 = vmatpush3.bf16.msra.mxu1 %v3492_v5 }
 0x7c9   : > { %3494 = vmatprep.subr.bf16.mxu1 %v3892_v0 }
 0x7cc   : > { %3496 = vmatpush3.bf16.msra.mxu1 %v3495_v7 }
 0x7cd   : > { %3375 = vmatprep.subr.mxu1 %v3894_v1 }
 0x7cf   : > { %3368 = vmatmul.mubr.msk.f32.vlgmr.msra.gmra.mrb[16].mxu1 %vm863_vm1, %v857_v12 }
 0x7d0   : > { %3377 = vmatprep.mubr.msk.f32.mxu1 %vm3893_vm0, %v3894_v1 }
 0x7db   : > { %v2130_v11 = vpop.permute.xlu0 %2129 }
 0x7df   : > { %v2296_v13 = vpop.permute.xlu0 %2295 }
 0x7e3   : > { %v2461_v16 = vpop.permute.xlu0 %2460 }
 0x89a   : > { %v1803_v9 = vpop.f32.mrb[14].mxu1 }
 0x89b   : > { %2127 = vrot.lane.b32.xlu1 %v1803_v9, %s3895_s7  ;;  %v3347_v10 = vpop.f32.mrb[15].mxu1  ;;  %3373 = vmatmul.mubr.msk.f32.vlgmr.msra.gmra.mrb[8].mxu0 %vm946_vm2, %v1803_v9 }
 0x89c   : > { %3381 = vmatpush3.xpose.msk.msra.mxu0 %vm946_vm2, %v2130_v11  ;;  %3382 = vmatprep.mubr.msk.f32.mxu0 %vm3893_vm0, %v3894_v1 }
 0x89d   : > { %3390 = vmatprep.subr.mxu0 %v3894_v1 }
 0x89f   : > { %2293 = vrot.lane.b32.xlu1 %v1803_v9, %s3900_s28 }
 0x8a2   : > { %v1957_v23 = vpop.f32.mrb[16].mxu1 }
 0x8a3   : > { %2458 = vrot.lane.b32.xlu1 %v1803_v9, %s3901_s25  ;;  %v3369_v24 = vpop.f32.mrb[17].mxu1  ;;  %3376 = vmatpush3.msra.mxu1 %v1957_v23 }
 0x8a4   : > { %3385 = vmatprep.subr.mxu1 %v3894_v1 }
 0x90d   : > { %v2128_v14 = vpop.permute.xlu1 %2127 }
 0x90e   : > { %3383 = vmatmul.mubr.msk.f32.vlgmr.msra.gmra.mrb[10].mxu0 %vm946_vm2, %v2128_v14  ;;  %v1962_v14 = vld [vmem:[%s4707_s13 + $0x8] sm:$0xff] }
 0x90f   : > { %3391 = vmatpush3.xpose.msk.msra.mxu0 %vm946_vm2, %v2296_v13  ;;  %3392 = vmatprep.mubr.msk.f32.mxu0 %vm3893_vm0, %v3894_v1  ;;  %v1961_v13 = vld [vmem:[%s4707_s13] sm:$0xff] }
 0x910   : > { %3400 = vmatprep.subr.mxu0 %v3894_v1 }
 0x911   : > { %v2294_v15 = vpop.permute.xlu1 %2293 }
 0x912   : > { %3393 = vmatmul.mubr.msk.f32.vlgmr.msra.gmra.mrb[12].mxu0 %vm946_vm2, %v2294_v15  ;;  %v3498_v15 = vpack.c.bf16 %v1962_v14, %v1961_v13 }
 0x913   : > { %3401 = vmatpush3.xpose.msk.msra.mxu0 %vm946_vm2, %v2461_v16  ;;  %3402 = vmatprep.mubr.msk.f32.mxu0 %vm3893_vm0, %v3894_v1  ;;  %v1963_v16 = vld [vmem:[%s4707_s13 + $0x10] sm:$0xff] }
 0x914   : > { %3497 = vmatprep.subr.bf16.mxu0 %v3892_v0 }
 0x915   : > { %v2459_v17 = vpop.permute.xlu1 %2458 }
 0x916   : > { %3403 = vmatmul.mubr.msk.f32.vlgmr.msra.gmra.mrb[14].mxu0 %vm946_vm2, %v2459_v17  ;;  %v1964_v17 = vld [vmem:[%s4707_s13 + $0x18] sm:$0xff] }
 0x917   : > { %3418 = vmatprep.mubr.msk.f32.mxu0 %vm3893_vm0, %v3894_v1  ;;  %3499 = vmatpush3.bf16.msra.mxu0 %v3498_v15 }
 0x918   : > { %3500 = vmatprep.subr.bf16.mxu0 %v3892_v0 }
 0x96e   : > { %v2039_v19 = vpop.f32.mrb[8].mxu0 }
 0x96f   : > { %v2040_v20 = vadd.f32 %v2039_v19, %v1966_v18  ;;  %v3374_v21 = vpop.f32.mrb[9].mxu0 }
 0x971   : > { %v2043_v22 = vsel %vm946_vm2, %v2040_v20, -inf }
 0x972   : > { %2044 = vmax.xlane.f32.xlu0 %v2043_v22 }
 0x9e1   : > { %v2201_v25 = vpop.f32.mrb[10].mxu0 }
 0x9e2   : > { %v2202_v26 = vadd.f32 %v2201_v25, %v1966_v18  ;;  %v3384_v27 = vpop.f32.mrb[11].mxu0 }
 0x9e4   : > { %v2205_v28 = vsel %vm946_vm2, %v2202_v26, -inf }
 0x9e5   : > { %2206 = vmax.xlane.f32.xlu1 %v2205_v28  ;;  %v2367_v29 = vpop.f32.mrb[12].mxu0 }
 0x9e6   : > { %v2368_v30 = vadd.f32 %v2367_v29, %v1966_v18  ;;  %v3394_v31 = vpop.f32.mrb[13].mxu0 }
 0x9e7   : > { %v3178_v31 = vld [vmem:[%s4708_s14] ss:$0 sm:$0xff] }
 0x9e8   : > { %v2371_v32 = vsel %vm946_vm2, %v2368_v30, -inf }
 0x9e9   : > { %2372 = vmax.xlane.f32.xlu0 %v2371_v32  ;;  %v2532_v33 = vpop.f32.mrb[14].mxu0 }
 0x9ea   : > { %v2533_v34 = vadd.f32 %v2532_v33, %v1966_v18  ;;  %v3404_v35 = vpop.f32.mrb[15].mxu0  ;;  %v3501_v18 = vpack.c.bf16 %v1964_v17, %v1963_v16  ;;  %v3182_v17 = vld [vmem:[#allocation8] ss:$0 sm:$0xff] }
 0x9ec   : > { %v2536_v36 = vsel %vm946_vm2, %v2533_v34, -inf  ;;  %3502 = vmatpush3.bf16.msra.mxu0 %v3501_v18 }
 0x9ed   : > { %2537 = vmax.xlane.f32.xlu0 %v2536_v36  ;;  %3509 = vmatprep.subr.bf16.mxu0 %v3892_v0 }
 0x9f6   : > { %2217 = vrot.lane.b32.xlu1 %v1957_v23, %s3895_s7  ;;  %s3188_s7 = sshll.u32 %s4051_s5, 7  ;;  %s3909_s5 = smov [#allocation11]  }
 0x9ff   : > { %v2045_v37 = vpop.xlane.xlu0 %2044 }
 0xa00   : > { %v2046_v38 = vsub.f32 %v2040_v20, %v2045_v37 }
 0xa02   : > { %v2047_v39 = vmul.f32 1.442695, %v2046_v38 }
 0xa04   : > { %3645 = vpow2.f32 %v2047_v39 }
 0xa0e   : > { %v3646_v40 = vpop.eup %3645 }
 0xa0f   : > { %v2049_v41 = vsel %vm946_vm2, %v3646_v40, 0.0 }
 0xa1a   : > { %2050 = vadd.xlane.f32.xlu1 %v2049_v41 }
 0xa72   : > { %v2207_v42 = vpop.xlane.xlu1 %2206 }
 0xa73   : > { %v2208_v8 = vsub.f32 %v2202_v26, %v2207_v42  ;;  %v2748_v42 = vld [vmem:[%s4711_s17 + $0x8] sm:$0xff] }
 0xa75   : > { %v2209_v43 = vmul.f32 1.442695, %v2208_v8 }
 0xa76   : > { %v2373_v44 = vpop.xlane.xlu0 %2372  ;;  %v2218_v56 = vpop.permute.xlu1 %2217 }
 0xa77   : > { %3647 = vpow2.f32 %v2209_v43  ;;  %v2374_v45 = vsub.f32 %v2368_v30, %v2373_v44  ;;  %v2750_v43 = vld [vmem:[%s4711_s17 + $0x18] sm:$0xff] }
 0xa79   : > { %v2375_v46 = vmul.f32 1.442695, %v2374_v45 }
 0xa7a   : > { %v2538_v47 = vpop.xlane.xlu0 %2537 }
 0xa7b   : > { %3649 = vpow2.f32 %v2375_v46  ;;  %v2539_v48 = vsub.f32 %v2533_v34, %v2538_v47 }
 0xa7d   : > { %v2540_v49 = vmul.f32 1.442695, %v2539_v48 }
 0xa7f   : > { %3651 = vpow2.f32 %v2540_v49 }
 0xa81   : > { %v3648_v50 = vpop.eup %3647 }
 0xa82   : > { %v2211_v51 = vsel %vm946_vm2, %v3648_v50, 0.0 }
 0xa83   : > { %2212 = vadd.xlane.f32.xlu0 %v2211_v51 }
 0xa85   : > { %v3650_v52 = vpop.eup %3649 }
 0xa86   : > { %v2377_v53 = vsel %vm946_vm2, %v3650_v52, 0.0 }
 0xa87   : > { %2378 = vadd.xlane.f32.xlu1 %v2377_v53 }
 0xa89   : > { %v3652_v54 = vpop.eup %3651 }
 0xa8a   : > { %v2542_v55 = vsel %vm946_vm2, %v3652_v54, 0.0 }
 0xa8b   : > { %2543 = vadd.xlane.f32.xlu0 %v2542_v55 }
 0xa98   : > { %2547 = vrot.lane.b32.xlu1 %v1957_v23, %s3901_s25 }
 0xaa1   : > { %2382 = vrot.lane.b32.xlu0 %v1957_v23, %s3900_s28  ;;  %s4812_s28 = sld [smem:[#allocation31_spill]] }
 0xaa7   : > { %v2051_v57 = vpop.xlane.xlu1 %2050 }
 0xaa8   : > { %3653 = vrcp.f32 %v2051_v57 }
 0xab2   : > { %v3654_v58 = vpop.eup %3653 }
 0xab3   : > { %v2053_v59 = vmul.f32 %v3654_v58, %v3646_v40 }
 0xab5   : > { %3378 = vmatmul.mubr.msk.f32.vlgmr.msra.gmra.mrb[18].mxu1 %vm946_vm2, %v2053_v59 }
 0xab6   : > { %3386 = vmatpush3.msra.mxu1 %v2218_v56  ;;  %3387 = vmatprep.mubr.msk.f32.mxu1 %vm3893_vm0, %v3894_v1 }
 0xab7   : > { %3395 = vmatprep.subr.mxu1 %v3894_v1 }
 0xb10   : > { %v2213_v60 = vpop.xlane.xlu0 %2212 }
 0xb11   : > { %3655 = vrcp.f32 %v2213_v60 }
 0xb14   : > { %v2379_v62 = vpop.xlane.xlu1 %2378 }
 0xb15   : > { %3657 = vrcp.f32 %v2379_v62 }
 0xb18   : > { %v2544_v63 = vpop.xlane.xlu0 %2543  ;;  %v2548_v7 = vpop.permute.xlu1 %2547 }
 0xb19   : > { %3659 = vrcp.f32 %v2544_v63 }
 0xb1b   : > { %v3656_v2 = vpop.eup %3655 }
 0xb1c   : > { %v2215_v3 = vmul.f32 %v3656_v2, %v3648_v50  ;;  %v2383_v4 = vpop.permute.xlu0 %2382 }
 0xb1e   : > { %3388 = vmatmul.mubr.msk.f32.vlgmr.msra.gmra.mrb[20].mxu1 %vm946_vm2, %v2215_v3 }
 0xb1f   : > { %v3658_v5 = vpop.eup %3657  ;;  %3396 = vmatpush3.msra.mxu1 %v2383_v4  ;;  %3397 = vmatprep.mubr.msk.f32.mxu1 %vm3893_vm0, %v3894_v1 }
 0xb20   : > { %v2381_v6 = vmul.f32 %v3658_v5, %v3650_v52  ;;  %3405 = vmatprep.subr.mxu1 %v3894_v1 }
 0xb22   : > { %3398 = vmatmul.mubr.msk.f32.vlgmr.msra.gmra.mrb[22].mxu1 %vm946_vm2, %v2381_v6 }
 0xb23   : > { %v3660_v9 = vpop.eup %3659  ;;  %3406 = vmatpush3.msra.mxu1 %v2548_v7  ;;  %3407 = vmatprep.mubr.msk.f32.mxu1 %vm3893_vm0, %v3894_v1 }
 0xb24   : > { %v2546_v10 = vmul.f32 %v3660_v9, %v3652_v54  ;;  %3503 = vmatprep.subr.bf16.mxu1 %v3892_v0 }
 0xb26   : > { %3408 = vmatmul.mubr.msk.f32.vlgmr.msra.gmra.mrb[24].mxu1 %vm946_vm2, %v2546_v10  ;;  %v3180_v10 = vld [vmem:[%s4811_s18] ss:$0 sm:$0xff] }
 0xb27   : > { %3429 = vmatprep.mubr.msk.f32.mxu1 %vm3893_vm0, %v3894_v1 }
 0xb88   : > { %v2123_v11 = vpop.f32.mrb[18].mxu1 }
 0xb89   : > { %v3379_v12 = vpop.f32.mrb[19].mxu1 }
 0xb8a   : > { %v3181_v12 = vld [vmem:[%s4812_s28] ss:$0 sm:$0xff]  ;;  %s847_s28 = scalar_lea.vmem [#allocation11], %s4265_s20  ;;  %s3815_s20 = sshll.u32 %s3909_s5, 4  ;;  %s3816_s20 = int_to_ptr.vmem [resolvable:$false] %s3815_s20 }
 0xb8b   : > { %s2970_s25 = sshll.u32 %s847_s28, 4  ;;  %s4651_s25 = int_to_ptr.vmem [resolvable:$true] %s2970_s25 }
 0xb8c   : > { %p3818_p3 = scmp.lt.s32.totalorder %s4651_s25, %s3816_s20 }
 0xbf1   : > { %v2289_v19 = vpop.f32.mrb[20].mxu1 }
 0xbf2   : > { %2624 = vrot.lane.b32.xlu1 %v2289_v19, %s4807_s3  ;;  %v3389_v20 = vpop.f32.mrb[21].mxu1  ;;  %s3811_s3 = scalar_lea.vmem %s4651_s25, 128 }
 0xbf3   : > { %p3812_p4 = scmp.ne.s32.totalorder %s4651_s25, %s3811_s3 }
 0xbf5   : > { %v2454_v21 = vpop.f32.mrb[22].mxu1  ;;  %p3813_p0 = pnand %p3812_p4, %p4817_p8 }
 0xbf6   : > { %2628 = vrot.lane.b32.xlu0 %v2454_v21, %s4808_s0  ;;  %v3399_v22 = vpop.f32.mrb[23].mxu1  ;;  %s4810_s0 = sld [smem:[#allocation33_spill]] }
 0xbf7   : > { %v3184_v22 = vld [vmem:[#allocation10] ss:$0 sm:$0xff]  ;;  %p3814_p11 = pneg %p3813_p0 }
 0xbf9   : > { %v2619_v23 = vpop.f32.mrb[24].mxu1 }
 0xbfa   : > { %2632 = vrot.lane.b32.xlu1 %v2619_v23, %s4809_s21  ;;  %v3409_v24 = vpop.f32.mrb[25].mxu1  ;;  %s4814_s21 = sld [smem:[#allocation35_spill]] }
 0xbfc   : > { %v2832_v45 = vld [vmem:[%s4810_s0] sm:$0xff]  ;;  %v2833_v46 = vld [vmem:[%s4810_s0 + $0x8] sm:$0xff]  ;;  %v2834_v47 = vld [vmem:[%s4810_s0 + $0x10] sm:$0xff] }
 0xbfd   : > { %v3510_v48 = vpack.c.bf16 %v2833_v46, %v2832_v45  ;;  %v2835_v49 = vld [vmem:[%s4810_s0 + $0x18] sm:$0xff]  ;;  %v2836_v51 = vld [vmem:[%s4810_s0 + $0x20] sm:$0xff]  ;;  %v2837_v52 = vld [vmem:[%s4810_s0 + $0x28] sm:$0xff] }
 0xbfe   : > { %v3513_v50 = vpack.c.bf16 %v2835_v49, %v2834_v47  ;;  %v3516_v53 = vpack.c.bf16 %v2837_v52, %v2836_v51  ;;  %v2838_v54 = vld [vmem:[%s4810_s0 + $0x30] sm:$0xff]  ;;  %v2839_v55 = vld [vmem:[%s4810_s0 + $0x38] sm:$0xff]  ;;  %v2840_v57 = vld [vmem:[%s4810_s0 + $0x40] sm:$0xff] }
 0xbff   : > { %v3519_v56 = vpack.c.bf16 %v2839_v55, %v2838_v54  ;;  %v2841_v58 = vld [vmem:[%s4810_s0 + $0x48] sm:$0xff]  ;;  %v2842_v60 = vld [vmem:[%s4810_s0 + $0x50] sm:$0xff]  ;;  %v2843_v62 = vld [vmem:[%s4810_s0 + $0x58] sm:$0xff] }
 0xc00   : > { %v3522_v59 = vpack.c.bf16 %v2841_v58, %v2840_v57  ;;  %v3525_v63 = vpack.c.bf16 %v2843_v62, %v2842_v60  ;;  %v2844_v2 = vld [vmem:[%s4810_s0 + $0x60] sm:$0xff]  ;;  %v2845_v3 = vld [vmem:[%s4810_s0 + $0x68] sm:$0xff]  ;;  %v2847_v15 = vld [vmem:[%s4810_s0 + $0x78] sm:$0xff] }
 0xc01   : > { %v3528_v4 = vpack.c.bf16 %v2845_v3, %v2844_v2 }
 0xc64   : > { %v2625_v25 = vpop.permute.xlu1 %2624 }
 0xc65   : > { %v2635_v27 = vsel %vm946_vm2, %v2123_v11, %v2625_v25 }
 0xc68   : > { %v2629_v26 = vpop.permute.xlu0 %2628 }
 0xc69   : > { %v2636_v28 = vsel %vm1616_vm3, %v2635_v27, %v2629_v26 }
 0xc6c   : > { %v2633_v29 = vpop.permute.xlu1 %2632 }
 0xc6d   : > { %v2637_v30 = vsel %vm1618_vm4, %v2636_v28, %v2633_v29 }
 0xc6e   : > { %3419 = vmatmul.mubr.msk.f32.vlgmr.msra.gmra.mrb[16].mxu0 %vm863_vm1, %v2637_v30 }
 0xc6f   : > { %3464 = vmatprep.mubr.msk.f32.mxu0 %vm3893_vm0, %v3894_v1  ;;  %v2747_v1 = vld [vmem:[%s4711_s17] sm:$0xff]  ;;  %3511 = vmatpush3.bf16.msra.mxu0 %v3510_v48 }
 0xc70   : > { %v3504_v8 = vpack.c.bf16 %v2748_v42, %v2747_v1  ;;  %3512 = vmatprep.subr.bf16.mxu0 %v3892_v0 }
 0xc72   : > { %3505 = vmatpush3.bf16.msra.mxu1 %v3504_v8 }
 0xc73   : > { %3506 = vmatprep.subr.bf16.mxu1 %v3892_v0  ;;  %3514 = vmatpush3.bf16.msra.mxu0 %v3513_v50 }
 0xc74   : > { %3515 = vmatprep.subr.bf16.mxu0 %v3892_v0 }
 0xc77   : > { %3517 = vmatpush3.bf16.msra.mxu0 %v3516_v53 }
 0xc78   : > { %3518 = vmatprep.subr.bf16.mxu0 %v3892_v0 }
 0xc7b   : > { %3520 = vmatpush3.bf16.msra.mxu0 %v3519_v56 }
 0xc7c   : > { %3521 = vmatprep.subr.bf16.mxu0 %v3892_v0 }
 0xc7f   : > { %3523 = vmatpush3.bf16.msra.mxu0 %v3522_v59 }
 0xc80   : > { %3524 = vmatprep.subr.bf16.mxu0 %v3892_v0 }
 0xc83   : > { %3526 = vmatpush3.bf16.msra.mxu0 %v3525_v63 }
 0xc84   : > { %3527 = vmatprep.subr.bf16.mxu0 %v3892_v0 }
 0xc87   : > { %3529 = vmatpush3.bf16.msra.mxu0 %v3528_v4 }
 0xc88   : > { %3530 = vmatprep.subr.bf16.mxu0 %v3892_v0  ;;  %v2846_v0 = vld [vmem:[%s4810_s0 + $0x70] sm:$0xff]  ;;  %s4649_s0 = scalar_lea.hbm %s4816_s19, %s3188_s7 }
 0xc89   : > { %v3531_v16 = vpack.c.bf16 %v2847_v15, %v2846_v0 }
 0xc8b   : > { %3532 = vmatpush3.bf16.msra.mxu0 %v3531_v16 }
 0xd41   : > { %v2713_v32 = vpop.f32.mrb[16].mxu0 }
 0xd42   : > { %v2714_v33 = vadd.f32 %v3178_v31, %v2713_v32  ;;  %v3420_v34 = vpop.f32.mrb[17].mxu0 }
 0xd44   : > { %v2717_v35 = vadd.f32 %v2714_v33, %v4449_v61  ;;  %v2749_v61 = vld [vmem:[%s4711_s17 + $0x10] sm:$0xff] }
 0xd45   : > { %v3507_v44 = vpack.c.bf16 %v2750_v43, %v2749_v61 }
 0xd46   : > { %v2720_v36 = vsel %vm863_vm1, %v2717_v35, 0.0 }
 0xd47   : > { %2721 = vadd.xlane.f32.xlu0 %v2720_v36  ;;  %3508 = vmatpush3.bf16.msra.mxu1 %v3507_v44 }
 0xdd4   : > { %v2722_v37 = vpop.xlane.xlu0 %2721 }
 0xdd5   : > { %v2723_v38 = vmul.f32 0.03125, %v2722_v37  ;;  %v3185_v37 = vld [vmem:[%s4814_s21] ss:$0 sm:$0xff]  ;;  %s3817_s21 = scalar_lea.vmem %s3816_s20, 256 }
 0xdd6   : > { %p3819_p1 = scmp.lt.s32.totalorder %s3817_s21, %s3811_s3 }
 0xdd7   : > { %v2724_v39 = vsub.f32 %v2717_v35, %v2723_v38 }
 0xdd8   : > { %p3820_p9 = por %p3819_p1, %p3818_p3 }
 0xdd9   : > { %v2725_v40 = vmul.f32 %v2724_v39, %v2724_v39 }
 0xdda   : > { %p3821_p5 = pnand %p3820_p9, %p3814_p11 }
 0xddb   : > { %v2726_v41 = vsel %vm863_vm1, %v2725_v40, 0.0 }
 0xddc   : > { %2727 = vadd.xlane.f32.xlu1 %v2726_v41 }
 0xe69   : > { %v2728_v5 = vpop.xlane.xlu1 %2727 }
 0xe6a   : > { %v2729_v6 = vmul.f32 0.03125, %v2728_v5 }
 0xe6c   : > { %v2730_v7 = vadd.f32 1e-05, %v2729_v6 }
 0xe6e   : > { %3661 = vrsqrt.f32 %v2730_v7 }
 0xe78   : > { %v3662_v9 = vpop.eup %3661 }
 0xe79   : > { %v2732_v11 = vmul.f32 %v3662_v9, %v2724_v39  ;;  %v3186_v39 = vld [vmem:[%s4815_s29] ss:$0 sm:$0xff] }
 0xe7b   : > { %v2739_v13 = vmul.f32 %v3180_v10, %v2732_v11 }
 0xe7d   : > { %v2746_v14 = vadd.f32 %v3181_v12, %v2739_v13 }
 0xe7f   : > { %3430 = vmatmul.mubr.msk.f32.vlgmr.msra.gmra.mrb[26].mxu1 %vm863_vm1, %v2746_v14 }
 0xf52   : > { %v2827_v18 = vpop.f32.mrb[26].mxu1 }
 0xf53   : > { %v2828_v19 = vadd.f32 %v3182_v17, %v2827_v18  ;;  %v3431_v20 = vpop.f32.mrb[27].mxu1 }
 0xf55   : > { %v2831_v21 = vmax.f32 %v2828_v19, 0.0 }
 0xf57   : > { %3465 = vmatmul.mubr.f32.vlgmr.msra.gmra.mrb[18].mxu0 %v2831_v21 }
0x102a   : > { %v2921_v23 = vpop.f32.mrb[18].mxu0 }
0x102b   : > { %v2922_v24 = vadd.f32 %v3184_v22, %v2921_v23  ;;  %v3466_v25 = vpop.f32.mrb[19].mxu0 }
0x102d   : > { %v2925_v26 = vadd.f32 %v2922_v24, %v2746_v14 }
0x102f   : > { %v2928_v27 = vsel %vm863_vm1, %v2925_v26, 0.0 }
0x1030   : > { %2929 = vadd.xlane.f32.xlu0 %v2928_v27 }
0x10bd   : > { %v2930_v28 = vpop.xlane.xlu0 %2929 }
0x10be   : > { %v2931_v29 = vmul.f32 0.03125, %v2930_v28 }
0x10c0   : > { %v2932_v30 = vsub.f32 %v2925_v26, %v2931_v29 }
0x10c2   : > { %v2933_v31 = vmul.f32 %v2932_v30, %v2932_v30 }
0x10c4   : > { %v2934_v32 = vsel %vm863_vm1, %v2933_v31, 0.0 }
0x10c5   : > { %2935 = vadd.xlane.f32.xlu0 %v2934_v32 }
0x1152   : > { %v2936_v33 = vpop.xlane.xlu0 %2935 }
0x1153   : > { %v2937_v34 = vmul.f32 0.03125, %v2936_v33 }
0x1155   : > { %v2938_v35 = vadd.f32 1e-05, %v2937_v34 }
0x1157   : > { %3663 = vrsqrt.f32 %v2938_v35 }
0x1161   : > { %v3664_v36 = vpop.eup %3663 }
0x1162   : > { %v2940_v38 = vmul.f32 %v3664_v36, %v2932_v30 }
0x1164   : > { %v2947_v40 = vmul.f32 %v3185_v37, %v2940_v38 }
0x1166   : > { %v2954_v41 = vadd.f32 %v3186_v39, %v2947_v40 }
0x1168   : > { %2955 = vst.msk [vmem:[%s847_s28] sm:$0xff] %vm863_vm1, %v2954_v41 }
0x1169   : > { %3824 = shalt.err (!%p3821_p5)
}
0x116a   : > { %s3825_s4 = scalar_lea.hbm %s4649_s0, 128  ;;  %s3829_s29 = scalar_lea.hbm %s4816_s19, 256 }
0x116b   : > { %p3826_p13 = scmp.ne.s32.totalorder %s4649_s0, %s3825_s4  ;;  %p3830_p6 = scmp.lt.u32.totalorder %s4649_s0, %s4816_s19 }
0x116c   : > { %p3831_p10 = scmp.lt.u32.totalorder %s3829_s29, %s3825_s4  ;;  %p3833_p4 = scmp.lt.u32.totalorder %s3825_s4, %s4649_s0 }
0x116d   : > { %p3827_p12 = pnand %p3826_p13, %p4817_p8 }
0x116e   : > { %p3832_p2 = por %p3831_p10, %p3830_p6 }
0x116f   : > { %p3828_p7 = pneg %p3827_p12 }
0x1170   : > { %p3834_p0 = por %p3833_p4, %p3832_p2 }
0x1172   : > { %p3835_p11 = pnand %p3834_p0, %p3828_p7 }
0x1174   : > { %3838 = shalt.err (!%p3835_p11)
}
0x1175   : > { %3547 = dma.vmem_to_hbm [thread:$0]  (%p4817_p8), %s4651_s25, 128, %s4649_s0, %s2957_s6  }
0x1176 PF: > { %s4818_s15 = sld [smem:[#allocation16_spill]]  ;;  %s4819_s16 = sld [smem:[#allocation18_spill]] }
0x1177   : > { %s4820_s3 = sld [smem:[#allocation17_spill]] }
0x117c   : > { %s2982_s5 = sand.u32 1, %s4818_s15   ;;  %p4821_p3 = scmp.ne.s32.totalorder %s4819_s16, 0 }
0x117d   : > { %p4822_p1 = scmp.ge.s32.totalorder %s4820_s3, 2  ;;  %s2983_s20 = scalar_lea.sflag [#allocation4], %s2982_s5 }
0x117f   : > { %p3567_p9 = pnand %p4822_p1, %p4821_p3 }
0x1181   : > { %3868 = dma.done.wait (!%p3567_p9), %s2983_s20, 128  }
0x1182   : > { %3870 = vsyncadd (!%p3567_p9), %s2983_s20, 4294967168  ;;  %s4823_s25 = sld [smem:[#allocation19_spill]]  ;;  %s4824_s21 = sld [smem:[#allocation20_spill]] }
0x1183   : > { %s4825_s4 = smov %s3877_s30  ;;  %s4826_s30 = smov %s3881_s24 }
0x1188   : > { %p40_p5 = scmp.ge.s32.totalorder %s4823_s25, 4   ;;  %s4827_s24 = smov %s4824_s21 }
0x118a   :  { %42 = sbr.rel (!%p40_p5) target bundleno = 25 (0x19), region = 195 }
0x1191   :  { %2988 = vsyncpa [#allocation3], 1 }
0x1192   :  { %2990 = vsyncpa [#allocation3 + $0x1], 1 }
0x1193   :  { %2991 = vsyncpa [#allocation6], 1 }
0x1194   :  { %2993 = vsyncpa [#allocation6 + $0x1], 1 }
0x1195   :  { %2994 = vsyncpa [#allocation9], 1 }
0x1196   :  { %2995 = vsyncpa [#allocation4], 1 }
0x1197   :  { %2997 = vsyncpa [#allocation4 + $0x1], 1 }

</bundles_post_ra>
